<compile_context>
chip_gen: v7x
topology: tpu7x:2x2x1
jax: 0.10.0
libtpu: 0.0.40
codegen_flags: <defaults>
</compile_context>

<pallas_src>
import jax
import jax.numpy as jnp
from jax.experimental import pallas as pl
from jax.experimental.pallas import tpu as pltpu

GIN_EPS = 0.0     # GINConv default eps (train_eps=False)
BN_EPS = 1e-5     # BatchNorm1d default eps
LANES = 128


def _round_up(v, m):
    return (v + m - 1) // m * m


def _pad2(a, rows, cols):
    return jnp.pad(a, ((0, rows - a.shape[0]), (0, cols - a.shape[1])))


# ---------------------------------------------------------------------------
# Fused kernel.  Grid = (3 conv layers [sequential], node row tiles).
#   refs: A tile, x, pool, stacked conv w1/b1/w2/b2 (per-layer block),
#         lin1 split-weights, lin1 bias, lin2 weight, lin2 bias, out,
#         scratch: h double-buffer (bf16), pooled features (f32).
# ---------------------------------------------------------------------------
def _gin_fused_kernel(a_ref, x_ref, pool_ref,
                      w1_ref, b1_ref, w2_ref, b2_ref,
                      w1s_ref, l1b_ref, l2w_ref, l2b_ref,
                      out_ref, h_buf, p_acc):
    l = pl.program_id(0)              # conv layer index (sequential)
    r = pl.program_id(1)              # node row tile index
    nt = pl.num_programs(1)

    np_ = h_buf.shape[0] // 2         # padded node count
    tm = a_ref.shape[0]               # row tile size
    nb = pool_ref.shape[0]            # number of graphs
    nbp = p_acc.shape[0] // 3         # sublane-aligned per-layer stride in p_acc

    f32 = jnp.float32
    bf16 = jnp.bfloat16
    dot = lambda u, v: jnp.dot(u, v, preferred_element_type=f32)

    # Layer-activation double buffer: layer l reads slot (l % 2), writes (l+1) % 2.
    in_slot = l % 2
    out_slot = (l + 1) % 2

    @pl.when((l == 0) & (r == 0))
    def _init():
        h_buf[0:np_, :] = x_ref[...]          # seed slot 0 with node features (bf16)

    # ---- GINConv aggregation: (A + (1+eps)I)[rows] @ h_prev  (bf16 MXU, f32 acc)
    in_start = pl.multiple_of(in_slot * np_, np_)
    h_prev = h_buf[pl.ds(in_start, np_), :]                       # (np_, W) bf16
    agg = dot(a_ref[...], h_prev)                                 # (tm, W)  f32

    # ---- MLP: Linear(+BN folded) -> ReLU -> Linear -> ReLU (bf16 MXU, f32 bias)
    z = jnp.maximum(dot(agg.astype(bf16), w1_ref[0]) + b1_ref[0], 0.0)
    h_tile = jnp.maximum(dot(z.astype(bf16), w2_ref[0]) + b2_ref[0], 0.0)

    out_start = pl.multiple_of(out_slot * np_ + r * tm, tm)
    h_buf[pl.ds(out_start, tm), :] = h_tile.astype(bf16)

    # ---- global_add_pool for this layer once all its row tiles are written ----
    @pl.when(r == nt - 1)
    def _pool():
        h_full = h_buf[pl.ds(pl.multiple_of(out_slot * np_, np_), np_), :]
        p = dot(pool_ref[...], h_full)                            # (nb, W) f32

        @pl.when(l == 0)
        def _():
            p_acc[0:nb, :] = p

        @pl.when(l == 1)
        def _():
            p_acc[nbp:nbp + nb, :] = p

        @pl.when(l == 2)
        def _():
            p_acc[2 * nbp:2 * nbp + nb, :] = p

    # ---- readout head: lin1 -> ReLU -> (dropout=id) -> lin2 -> log_softmax ----
    @pl.when((l == 2) & (r == nt - 1))
    def _head():
        p1 = p_acc[0:nb, :]
        p2 = p_acc[nbp:nbp + nb, :]
        p3 = p_acc[2 * nbp:2 * nbp + nb, :]
        # cat(p1,p2,p3) @ W1 == p1 @ W1[:H] + p2 @ W1[H:2H] + p3 @ W1[2H:]
        g = (dot(p1, w1s_ref[0]) + dot(p2, w1s_ref[1]) + dot(p3, w1s_ref[2])
             + l1b_ref[...])
        g = jnp.maximum(g, 0.0)
        logits = dot(g, l2w_ref[...]) + l2b_ref[...]
        m = jnp.max(logits, axis=1, keepdims=True)
        lse = m + jnp.log(jnp.sum(jnp.exp(logits - m), axis=1, keepdims=True))
        out_ref[...] = logits - lse


# ---------------------------------------------------------------------------
# Host-side helpers
# ---------------------------------------------------------------------------
def _fold_bn(p):
    # BN(eval) after Linear folds into the Linear:
    #   (x @ W + b) * scale + shift == x @ (W * scale) + (b * scale + shift)
    w1f = p["w1"] * p["scale"]
    b1f = p["b1"] * p["scale"] + p["shift"]
    return w1f, b1f


def _build_graph_mats_bf16(x, edge_index, batch, num_graphs, n_pad, w_pad):
    # Builds (A + (1+eps)I), the pooling matrix and padded features directly in
    # bf16 with a single scatter (no dense eye, no f32 N^2 temporaries).
    n = x.shape[0]
    src, dst = edge_index[0], edge_index[1]
    diag = jnp.arange(n, dtype=jnp.int32)
    rows = jnp.concatenate([dst, diag])
    cols = jnp.concatenate([src, diag])
    vals = jnp.concatenate([jnp.ones(src.shape[0], jnp.float32),
                            jnp.full((n,), 1.0 + GIN_EPS, jnp.float32)]
                           ).astype(jnp.bfloat16)
    a = jnp.zeros((n_pad, n_pad), jnp.bfloat16).at[rows, cols].add(vals)
    pool = (batch[None, :] == jnp.arange(num_graphs)[:, None])
    pool = jnp.pad(pool, ((0, 0), (0, n_pad - n))).astype(jnp.bfloat16)
    x_p = _pad2(x, n_pad, w_pad).astype(jnp.bfloat16)
    return a, pool, x_p


def gin_forward(params, x, edge_index, batch, num_graphs, *, row_tile=64):
    n, f_in = x.shape
    dim_h = params["conv2"]["w1"].shape[0]
    n_classes = params["lin2_w"].shape[1]

    w_pad = _round_up(max(f_in, dim_h), LANES)    # lane-dense hidden width
    o_pad = _round_up(3 * dim_h, LANES)           # lane-dense lin1 output width
    n_pad = _round_up(max(n, row_tile), LANES)    # node axis padded to 128-multiple
    assert n_pad % row_tile == 0
    n_tiles = n_pad // row_tile
    nb_pad = _round_up(num_graphs, 8)             # sublane-aligned pooled scratch

    a, pool, x_p = _build_graph_mats_bf16(x, edge_index, batch, num_graphs,
                                          n_pad, w_pad)

    # Pack the 3 convs' (BN-folded) weights into 4 stacked arrays (fewer DMAs).
    w1s, b1s, w2s, b2s = [], [], [], []
    for name in ("conv1", "conv2", "conv3"):
        p = params[name]
        w1f, b1f = _fold_bn(p)
        w1s.append(_pad2(w1f, w_pad, w_pad))
        b1s.append(_pad2(b1f, 1, w_pad))
        w2s.append(_pad2(p["w2"], w_pad, w_pad))
        b2s.append(_pad2(p["b2"], 1, w_pad))
    w1_stack = jnp.stack(w1s).astype(jnp.bfloat16)   # (3, W, W) bf16
    b1_stack = jnp.stack(b1s)                        # (3, 1, W) f32
    w2_stack = jnp.stack(w2s).astype(jnp.bfloat16)   # (3, W, W) bf16
    b2_stack = jnp.stack(b2s)                        # (3, 1, W) f32

    # Head (kept f32; tiny).  lin1 weight split into the 3 per-layer chunks.
    w1 = params["lin1_w"]                            # (3H, 3H)
    w1_split = jnp.stack([_pad2(w1[i * dim_h:(i + 1) * dim_h, :], w_pad, o_pad)
                          for i in range(3)])        # (3, W, O) f32
    lin1_b = _pad2(params["lin1_b"], 1, o_pad)
    lin2_w = _pad2(params["lin2_w"], o_pad, n_classes)
    lin2_b = params["lin2_b"]

    grid = (3, n_tiles)
    in_specs = [
        pl.BlockSpec((row_tile, n_pad), lambda l, r: (r, 0)),     # A: streamed tiles
        pl.BlockSpec((n_pad, w_pad), lambda l, r: (0, 0)),        # x: resident
        pl.BlockSpec((num_graphs, n_pad), lambda l, r: (0, 0)),   # pool: resident
        pl.BlockSpec((1, w_pad, w_pad), lambda l, r: (l, 0, 0)),  # conv w1 (per layer)
        pl.BlockSpec((1, 1, w_pad), lambda l, r: (l, 0, 0)),      # conv b1
        pl.BlockSpec((1, w_pad, w_pad), lambda l, r: (l, 0, 0)),  # conv w2
        pl.BlockSpec((1, 1, w_pad), lambda l, r: (l, 0, 0)),      # conv b2
        pl.BlockSpec((3, w_pad, o_pad), lambda l, r: (0, 0, 0)),  # lin1 split weights
        pl.BlockSpec((1, o_pad), lambda l, r: (0, 0)),            # lin1 bias
        pl.BlockSpec((o_pad, n_classes), lambda l, r: (0, 0)),    # lin2 weight
        pl.BlockSpec((1, n_classes), lambda l, r: (0, 0)),        # lin2 bias
    ]
    out_spec = pl.BlockSpec((num_graphs, n_classes), lambda l, r: (0, 0))
    scratch = [
        pltpu.VMEM((2 * n_pad, w_pad), jnp.bfloat16),     # layer-activation dbl buffer
        pltpu.VMEM((3 * nb_pad, w_pad), jnp.float32),     # per-layer pooled features
    ]

    return pl.pallas_call(
        _gin_fused_kernel,
        grid=grid,
        out_shape=jax.ShapeDtypeStruct((num_graphs, n_classes), jnp.float32),
        in_specs=in_specs,
        out_specs=out_spec,
        scratch_shapes=scratch,
        compiler_params=pltpu.CompilerParams(
            dimension_semantics=("arbitrary", "arbitrary"),
            vmem_limit_bytes=48 * 1024 * 1024,
        ),
    )(a, x_p, pool, w1_stack, b1_stack, w2_stack, b2_stack,
      w1_split, lin1_b, lin2_w, lin2_b)


# ---------------------------------------------------------------------------
# Parameter init (deterministic, PyTorch-Linear-style uniform)
# ---------------------------------------------------------------------------
def _linear_params(key, fan_in, fan_out):
    kw, kb = jax.random.split(key)
    bound = 1.0 / (float(fan_in) ** 0.5)
    w = jax.random.uniform(kw, (fan_in, fan_out), jnp.float32, -bound, bound)
    b = jax.random.uniform(kb, (1, fan_out), jnp.float32, -bound, bound)
    return w, b


def _gin_conv_params(key, fan_in, dim_h):
    k1, k2 = jax.random.split(key)
    w1, b1 = _linear_params(k1, fan_in, dim_h)
    w2, b2 = _linear_params(k2, dim_h, dim_h)
    # BatchNorm1d defaults: gamma=1, beta=0, running_mean=0, running_var=1.
    gamma = jnp.ones((1, dim_h), jnp.float32)
    beta = jnp.zeros((1, dim_h), jnp.float32)
    running_mean = jnp.zeros((1, dim_h), jnp.float32)
    running_var = jnp.ones((1, dim_h), jnp.float32)
    scale = gamma / jnp.sqrt(running_var + BN_EPS)
    shift = beta - running_mean * scale
    return {"w1": w1, "b1": b1, "scale": scale, "shift": shift, "w2": w2, "b2": b2}


def init_gin_params(key, num_node_features, dim_h, num_classes):
    k1, k2, k3, k4, k5 = jax.random.split(key, 5)
    lin1_w, lin1_b = _linear_params(k4, dim_h * 3, dim_h * 3)
    lin2_w, lin2_b = _linear_params(k5, dim_h * 3, num_classes)
    return {
        "conv1": _gin_conv_params(k1, num_node_features, dim_h),
        "conv2": _gin_conv_params(k2, dim_h, dim_h),
        "conv3": _gin_conv_params(k3, dim_h, dim_h),
        "lin1_w": lin1_w, "lin1_b": lin1_b,
        "lin2_w": lin2_w, "lin2_b": lin2_b,
    }


# ---------------------------------------------------------------------------
# Pure-JAX f32 reference (un-folded BN) for correctness check
# ---------------------------------------------------------------------------
def gin_forward_ref(params, x, edge_index, batch, num_graphs):
    n = x.shape[0]
    src, dst = edge_index[0], edge_index[1]
    a = jnp.zeros((n, n), jnp.float32).at[dst, src].add(1.0)
    a_plus = a + (1.0 + GIN_EPS) * jnp.eye(n, dtype=jnp.float32)
    pool = (batch[None, :] == jnp.arange(num_graphs)[:, None]).astype(jnp.float32)

    def conv(p, h):
        z = (a_plus @ h) @ p["w1"] + p["b1"]
        z = z * p["scale"] + p["shift"]
        z = jax.nn.relu(z)
        return jax.nn.relu(z @ p["w2"] + p["b2"])

    h1 = conv(params["conv1"], x)
    h2 = conv(params["conv2"], h1)
    h3 = conv(params["conv3"], h2)
    g = jnp.concatenate([pool @ h1, pool @ h2, pool @ h3], axis=1)
    g = jax.nn.relu(g @ params["lin1_w"] + params["lin1_b"])
    logits = g @ params["lin2_w"] + params["lin2_b"]
    return jax.nn.log_softmax(logits, axis=1)


if __name__ == "__main__":
    key = jax.random.PRNGKey(0)
    N_NODES = 16          # total nodes over the mini-batch of graphs
    F_IN = 4              # dataset.num_node_features (synthetic)
    DIM_H = 32
    N_CLASSES = 2         # dataset.num_classes (PROTEINS)
    N_GRAPHS = 2

    kx, kp = jax.random.split(key)
    x = jax.random.normal(kx, (N_NODES, F_IN), jnp.float32)

    # two undirected ring graphs of 8 nodes each
    src, dst = [], []
    for g in range(N_GRAPHS):
        base = g * 8
        for i in range(8):
            a_, b_ = base + i, base + (i + 1) % 8
            src += [a_, b_]
            dst += [b_, a_]
    edge_index = jnp.array([src, dst], dtype=jnp.int32)
    batch = jnp.array([0] * 8 + [1] * 8, dtype=jnp.int32)

    params = init_gin_params(kp, F_IN, DIM_H, N_CLASSES)

    out = gin_forward(params, x, edge_index, batch, N_GRAPHS)
    out = jax.block_until_ready(out)

    ref = gin_forward_ref(params, x, edge_index, batch, N_GRAPHS)
    assert out.shape == (N_GRAPHS, N_CLASSES)
    # Tolerance loosened vs. f32 reference because activations/weights run in
    # bf16 on the MXU (f32 accumulation) per the performance review.
    assert jnp.allclose(out, ref, atol=5e-2, rtol=5e-2), (out, ref)
    print("KERNEL_OK")
</pallas_src>

<mosaic_0001>
module attributes {stable_mosaic.version = 11 : i64} {
  func.func @_gin_fused_kernel(%arg0: i32, %arg1: i32, %arg2: memref<64x128xbf16, #tpu.memory_space<vmem>>, %arg3: memref<128x128xbf16, #tpu.memory_space<vmem>>, %arg4: memref<2x128xbf16, #tpu.memory_space<vmem>>, %arg5: memref<1x128x128xbf16, #tpu.memory_space<vmem>>, %arg6: memref<1x1x128xf32, #tpu.memory_space<vmem>>, %arg7: memref<1x128x128xbf16, #tpu.memory_space<vmem>>, %arg8: memref<1x1x128xf32, #tpu.memory_space<vmem>>, %arg9: memref<3x128x128xf32, #tpu.memory_space<vmem>>, %arg10: memref<1x128xf32, #tpu.memory_space<vmem>>, %arg11: memref<128x2xf32, #tpu.memory_space<vmem>>, %arg12: memref<1x2xf32, #tpu.memory_space<vmem>>, %arg13: memref<2x2xf32, #tpu.memory_space<vmem>>, %arg14: memref<256x128xbf16, #tpu.memory_space<vmem>>, %arg15: memref<24x128xf32, #tpu.memory_space<vmem>>) attributes {dimension_semantics = [#tpu.dimension_semantics<arbitrary>, #tpu.dimension_semantics<arbitrary>], iteration_bounds = array<i64: 3, 2>, scalar_prefetch = 0 : i64, scratch_operands = 2 : i64, tpu.core_type = #tpu.core_type<tc>, window_params = [{transform_indices = @transform_0, window_bounds = array<i64: 64, 128>}, {pipeline_mode = #tpu.pipeline_mode<synchronous>, transform_indices = @transform_1, window_bounds = array<i64: 128, 128>}, {pipeline_mode = #tpu.pipeline_mode<synchronous>, transform_indices = @transform_2, window_bounds = array<i64: 2, 128>}, {transform_indices = @transform_3, window_bounds = array<i64: 1, 128, 128>}, {transform_indices = @transform_4, window_bounds = array<i64: 1, 1, 128>}, {transform_indices = @transform_5, window_bounds = array<i64: 1, 128, 128>}, {transform_indices = @transform_6, window_bounds = array<i64: 1, 1, 128>}, {pipeline_mode = #tpu.pipeline_mode<synchronous>, transform_indices = @transform_7, window_bounds = array<i64: 3, 128, 128>}, {pipeline_mode = #tpu.pipeline_mode<synchronous>, transform_indices = @transform_8, window_bounds = array<i64: 1, 128>}, {pipeline_mode = #tpu.pipeline_mode<synchronous>, transform_indices = @transform_9, window_bounds = array<i64: 128, 2>}, {pipeline_mode = #tpu.pipeline_mode<synchronous>, transform_indices = @transform_10, window_bounds = array<i64: 1, 2>}, {pipeline_mode = #tpu.pipeline_mode<synchronous>, transform_indices = @transform_11, window_bounds = array<i64: 2, 2>}]} {
    %c2_i32 = arith.constant 2 : i32
    %c0_i32 = arith.constant 0 : i32
    %0 = arith.cmpi eq, %c2_i32, %c0_i32 : i32
    %c1_i32 = arith.constant 1 : i32
    %1 = arith.select %0, %c1_i32, %c2_i32 : i32
    %2 = arith.remsi %arg0, %1 : i32
    %c0_i32_0 = arith.constant 0 : i32
    %3 = arith.cmpi ne, %2, %c0_i32_0 : i32
    %c0_i32_1 = arith.constant 0 : i32
    %4 = arith.cmpi slt, %2, %c0_i32_1 : i32
    %c0_i32_2 = arith.constant 0 : i32
    %5 = arith.cmpi slt, %1, %c0_i32_2 : i32
    %6 = arith.xori %4, %5 : i1
    %7 = arith.andi %6, %3 : i1
    %8 = arith.addi %2, %1 : i32
    %9 = arith.select %7, %8, %2 : i32
    %c1_i32_3 = arith.constant 1 : i32
    %10 = arith.addi %arg0, %c1_i32_3 : i32
    %c2_i32_4 = arith.constant 2 : i32
    %c0_i32_5 = arith.constant 0 : i32
    %11 = arith.cmpi eq, %c2_i32_4, %c0_i32_5 : i32
    %c1_i32_6 = arith.constant 1 : i32
    %12 = arith.select %11, %c1_i32_6, %c2_i32_4 : i32
    %13 = arith.remsi %10, %12 : i32
    %c0_i32_7 = arith.constant 0 : i32
    %14 = arith.cmpi ne, %13, %c0_i32_7 : i32
    %c0_i32_8 = arith.constant 0 : i32
    %15 = arith.cmpi slt, %13, %c0_i32_8 : i32
    %c0_i32_9 = arith.constant 0 : i32
    %16 = arith.cmpi slt, %12, %c0_i32_9 : i32
    %17 = arith.xori %15, %16 : i1
    %18 = arith.andi %17, %14 : i1
    %19 = arith.addi %13, %12 : i32
    %20 = arith.select %18, %19, %13 : i32
    %c0_i32_10 = arith.constant 0 : i32
    %21 = arith.cmpi eq, %arg0, %c0_i32_10 : i32
    %c0_i32_11 = arith.constant 0 : i32
    %22 = arith.cmpi eq, %arg1, %c0_i32_11 : i32
    %23 = arith.andi %21, %22 : i1
    %24 = arith.extui %23 : i1 to i32
    %c0_i32_12 = arith.constant 0 : i32
    %25 = arith.cmpi ne, %24, %c0_i32_12 : i32
    scf.if %25 {
      %c0_38 = arith.constant 0 : index
      %c0_39 = arith.constant 0 : index
      %67 = vector.load %arg3[%c0_38, %c0_39] : memref<128x128xbf16, #tpu.memory_space<vmem>>, vector<128x128xbf16>
      %c0_40 = arith.constant 0 : index
      %c0_41 = arith.constant 0 : index
      %68 = vector.load %arg14[%c0_40, %c0_41] : memref<256x128xbf16, #tpu.memory_space<vmem>>, vector<128x128xbf16>
      tpu.vector_store %arg14[%c0_40, %c0_41], %67 {strides = array<i32>} : memref<256x128xbf16, #tpu.memory_space<vmem>>, vector<128x128xbf16>,
    } else {
    }
    %c128_i32 = arith.constant 128 : i32
    %26 = arith.muli %9, %c128_i32 : i32
    %27 = tpu.assume_multiple %26, 128 : i32
    %28 = arith.index_cast %27 : i32 to index
    %c0 = arith.constant 0 : index
    %29 = vector.load %arg14[%28, %c0] : memref<256x128xbf16, #tpu.memory_space<vmem>>, vector<128x128xbf16>
    %c0_13 = arith.constant 0 : index
    %c0_14 = arith.constant 0 : index
    %30 = vector.load %arg2[%c0_13, %c0_14] : memref<64x128xbf16, #tpu.memory_space<vmem>>, vector<64x128xbf16>
    %cst = arith.constant dense<0.000000e+00> : vector<64x128xf32>
    %31 = tpu.matmul %30, %29, %cst {dimension_numbers = #tpu.dot_dimension_numbers<[1], [0], [0], [1], [0, 0, 1, 1], [], []>} : vector<64x128xbf16>, vector<128x128xbf16>, vector<64x128xf32> -> vector<64x128xf32>
    %32 = arith.truncf %31 : vector<64x128xf32> to vector<64x128xbf16>
    %c0_15 = arith.constant 0 : index
    %c0_16 = arith.constant 0 : index
    %c0_17 = arith.constant 0 : index
    %33 = vector.load %arg5[%c0_15, %c0_16, %c0_17] : memref<1x128x128xbf16, #tpu.memory_space<vmem>>, vector<1x128x128xbf16>
    %34 = vector.shape_cast %33 : vector<1x128x128xbf16> to vector<128x128xbf16>
    %cst_18 = arith.constant dense<0.000000e+00> : vector<64x128xf32>
    %35 = tpu.matmul %32, %34, %cst_18 {dimension_numbers = #tpu.dot_dimension_numbers<[1], [0], [0], [1], [0, 0, 1, 1], [], []>} : vector<64x128xbf16>, vector<128x128xbf16>, vector<64x128xf32> -> vector<64x128xf32>
    %c0_19 = arith.constant 0 : index
    %c0_20 = arith.constant 0 : index
    %c0_21 = arith.constant 0 : index
    %36 = vector.load %arg6[%c0_19, %c0_20, %c0_21] : memref<1x1x128xf32, #tpu.memory_space<vmem>>, vector<1x1x128xf32>
    %37 = vector.shape_cast %36 : vector<1x1x128xf32> to vector<1x128xf32>
    %38 = vector.broadcast %37 : vector<1x128xf32> to vector<64x128xf32>
    %39 = arith.addf %35, %38 : vector<64x128xf32>
    %cst_22 = arith.constant 0.000000e+00 : f32
    %40 = vector.broadcast %cst_22 : f32 to vector<64x128xf32>
    %41 = arith.maximumf %39, %40 : vector<64x128xf32>
    %42 = arith.truncf %41 : vector<64x128xf32> to vector<64x128xbf16>
    %c0_23 = arith.constant 0 : index
    %c0_24 = arith.constant 0 : index
    %c0_25 = arith.constant 0 : index
    %43 = vector.load %arg7[%c0_23, %c0_24, %c0_25] : memref<1x128x128xbf16, #tpu.memory_space<vmem>>, vector<1x128x128xbf16>
    %44 = vector.shape_cast %43 : vector<1x128x128xbf16> to vector<128x128xbf16>
    %cst_26 = arith.constant dense<0.000000e+00> : vector<64x128xf32>
    %45 = tpu.matmul %42, %44, %cst_26 {dimension_numbers = #tpu.dot_dimension_numbers<[1], [0], [0], [1], [0, 0, 1, 1], [], []>} : vector<64x128xbf16>, vector<128x128xbf16>, vector<64x128xf32> -> vector<64x128xf32>
    %c0_27 = arith.constant 0 : index
    %c0_28 = arith.constant 0 : index
    %c0_29 = arith.constant 0 : index
    %46 = vector.load %arg8[%c0_27, %c0_28, %c0_29] : memref<1x1x128xf32, #tpu.memory_space<vmem>>, vector<1x1x128xf32>
    %47 = vector.shape_cast %46 : vector<1x1x128xf32> to vector<1x128xf32>
    %48 = vector.broadcast %47 : vector<1x128xf32> to vector<64x128xf32>
    %49 = arith.addf %45, %48 : vector<64x128xf32>
    %cst_30 = arith.constant 0.000000e+00 : f32
    %50 = vector.broadcast %cst_30 : f32 to vector<64x128xf32>
    %51 = arith.maximumf %49, %50 : vector<64x128xf32>
    %c128_i32_31 = arith.constant 128 : i32
    %52 = arith.muli %20, %c128_i32_31 : i32
    %c64_i32 = arith.constant 64 : i32
    %53 = arith.muli %arg1, %c64_i32 : i32
    %54 = arith.addi %52, %53 : i32
    %55 = tpu.assume_multiple %54, 64 : i32
    %56 = arith.truncf %51 : vector<64x128xf32> to vector<64x128xbf16>
    %57 = arith.index_cast %55 : i32 to index
    %c0_32 = arith.constant 0 : index
    %58 = vector.load %arg14[%57, %c0_32] : memref<256x128xbf16, #tpu.memory_space<vmem>>, vector<64x128xbf16>
    tpu.vector_store %arg14[%57, %c0_32], %56 {strides = array<i32>} : memref<256x128xbf16, #tpu.memory_space<vmem>>, vector<64x128xbf16>,
    %c1_i32_33 = arith.constant 1 : i32
    %59 = arith.cmpi eq, %arg1, %c1_i32_33 : i32
    %60 = arith.extui %59 : i1 to i32
    %c0_i32_34 = arith.constant 0 : i32
    %61 = arith.cmpi ne, %60, %c0_i32_34 : i32
    scf.if %61 {
      %c128_i32_38 = arith.constant 128 : i32
      %67 = arith.muli %20, %c128_i32_38 : i32
      %68 = tpu.assume_multiple %67, 128 : i32
      %69 = arith.index_cast %68 : i32 to index
      %c0_39 = arith.constant 0 : index
      %70 = vector.load %arg14[%69, %c0_39] : memref<256x128xbf16, #tpu.memory_space<vmem>>, vector<128x128xbf16>
      %c0_40 = arith.constant 0 : index
      %c0_41 = arith.constant 0 : index
      %71 = vector.load %arg4[%c0_40, %c0_41] : memref<2x128xbf16, #tpu.memory_space<vmem>>, vector<2x128xbf16>
      %cst_42 = arith.constant dense<0.000000e+00> : vector<2x128xf32>
      %72 = tpu.matmul %71, %70, %cst_42 {dimension_numbers = #tpu.dot_dimension_numbers<[1], [0], [0], [1], [0, 0, 1, 1], [], []>} : vector<2x128xbf16>, vector<128x128xbf16>, vector<2x128xf32> -> vector<2x128xf32>
      %c0_i32_43 = arith.constant 0 : i32
      %73 = arith.cmpi eq, %arg0, %c0_i32_43 : i32
      %74 = arith.extui %73 : i1 to i32
      %c0_i32_44 = arith.constant 0 : i32
      %75 = arith.cmpi ne, %74, %c0_i32_44 : i32
      scf.if %75 {
        %c0_49 = arith.constant 0 : index
        %c0_50 = arith.constant 0 : index
        %82 = vector.load %arg15[%c0_49, %c0_50] : memref<24x128xf32, #tpu.memory_space<vmem>>, vector<2x128xf32>
        tpu.vector_store %arg15[%c0_49, %c0_50], %72 {strides = array<i32>} : memref<24x128xf32, #tpu.memory_space<vmem>>, vector<2x128xf32>,
      } else {
      }
      %c1_i32_45 = arith.constant 1 : i32
      %76 = arith.cmpi eq, %arg0, %c1_i32_45 : i32
      %77 = arith.extui %76 : i1 to i32
      %c0_i32_46 = arith.constant 0 : i32
      %78 = arith.cmpi ne, %77, %c0_i32_46 : i32
      scf.if %78 {
        %c8 = arith.constant 8 : index
        %c0_49 = arith.constant 0 : index
        %82 = vector.load %arg15[%c8, %c0_49] : memref<24x128xf32, #tpu.memory_space<vmem>>, vector<2x128xf32>
        tpu.vector_store %arg15[%c8, %c0_49], %72 {strides = array<i32>} : memref<24x128xf32, #tpu.memory_space<vmem>>, vector<2x128xf32>,
      } else {
      }
      %c2_i32_47 = arith.constant 2 : i32
      %79 = arith.cmpi eq, %arg0, %c2_i32_47 : i32
      %80 = arith.extui %79 : i1 to i32
      %c0_i32_48 = arith.constant 0 : i32
      %81 = arith.cmpi ne, %80, %c0_i32_48 : i32
      scf.if %81 {
        %c16 = arith.constant 16 : index
        %c0_49 = arith.constant 0 : index
        %82 = vector.load %arg15[%c16, %c0_49] : memref<24x128xf32, #tpu.memory_space<vmem>>, vector<2x128xf32>
        tpu.vector_store %arg15[%c16, %c0_49], %72 {strides = array<i32>} : memref<24x128xf32, #tpu.memory_space<vmem>>, vector<2x128xf32>,
      } else {
      }
    } else {
    }
    %c2_i32_35 = arith.constant 2 : i32
    %62 = arith.cmpi eq, %arg0, %c2_i32_35 : i32
    %c1_i32_36 = arith.constant 1 : i32
    %63 = arith.cmpi eq, %arg1, %c1_i32_36 : i32
    %64 = arith.andi %62, %63 : i1
    %65 = arith.extui %64 : i1 to i32
    %c0_i32_37 = arith.constant 0 : i32
    %66 = arith.cmpi ne, %65, %c0_i32_37 : i32
    scf.if %66 {
      %c0_38 = arith.constant 0 : index
      %c0_39 = arith.constant 0 : index
      %67 = vector.load %arg15[%c0_38, %c0_39] : memref<24x128xf32, #tpu.memory_space<vmem>>, vector<2x128xf32>
      %c8 = arith.constant 8 : index
      %c0_40 = arith.constant 0 : index
      %68 = vector.load %arg15[%c8, %c0_40] : memref<24x128xf32, #tpu.memory_space<vmem>>, vector<2x128xf32>
      %c16 = arith.constant 16 : index
      %c0_41 = arith.constant 0 : index
      %69 = vector.load %arg15[%c16, %c0_41] : memref<24x128xf32, #tpu.memory_space<vmem>>, vector<2x128xf32>
      %c0_42 = arith.constant 0 : index
      %c0_43 = arith.constant 0 : index
      %c0_44 = arith.constant 0 : index
      %70 = vector.load %arg9[%c0_42, %c0_43, %c0_44] : memref<3x128x128xf32, #tpu.memory_space<vmem>>, vector<1x128x128xf32>
      %71 = vector.shape_cast %70 : vector<1x128x128xf32> to vector<128x128xf32>
      %cst_45 = arith.constant dense<0.000000e+00> : vector<2x128xf32>
      %72 = tpu.matmul %67, %71, %cst_45 {dimension_numbers = #tpu.dot_dimension_numbers<[1], [0], [0], [1], [0, 0, 1, 1], [], []>} : vector<2x128xf32>, vector<128x128xf32>, vector<2x128xf32> -> vector<2x128xf32>
      %c1 = arith.constant 1 : index
      %c0_46 = arith.constant 0 : index
      %c0_47 = arith.constant 0 : index
      %73 = vector.load %arg9[%c1, %c0_46, %c0_47] : memref<3x128x128xf32, #tpu.memory_space<vmem>>, vector<1x128x128xf32>
      %74 = vector.shape_cast %73 : vector<1x128x128xf32> to vector<128x128xf32>
      %cst_48 = arith.constant dense<0.000000e+00> : vector<2x128xf32>
      %75 = tpu.matmul %68, %74, %cst_48 {dimension_numbers = #tpu.dot_dimension_numbers<[1], [0], [0], [1], [0, 0, 1, 1], [], []>} : vector<2x128xf32>, vector<128x128xf32>, vector<2x128xf32> -> vector<2x128xf32>
      %76 = arith.addf %72, %75 : vector<2x128xf32>
      %c2 = arith.constant 2 : index
      %c0_49 = arith.constant 0 : index
      %c0_50 = arith.constant 0 : index
      %77 = vector.load %arg9[%c2, %c0_49, %c0_50] : memref<3x128x128xf32, #tpu.memory_space<vmem>>, vector<1x128x128xf32>
      %78 = vector.shape_cast %77 : vector<1x128x128xf32> to vector<128x128xf32>
      %cst_51 = arith.constant dense<0.000000e+00> : vector<2x128xf32>
      %79 = tpu.matmul %69, %78, %cst_51 {dimension_numbers = #tpu.dot_dimension_numbers<[1], [0], [0], [1], [0, 0, 1, 1], [], []>} : vector<2x128xf32>, vector<128x128xf32>, vector<2x128xf32> -> vector<2x128xf32>
      %80 = arith.addf %76, %79 : vector<2x128xf32>
      %c0_52 = arith.constant 0 : index
      %c0_53 = arith.constant 0 : index
      %81 = vector.load %arg10[%c0_52, %c0_53] : memref<1x128xf32, #tpu.memory_space<vmem>>, vector<1x128xf32>
      %82 = vector.broadcast %81 : vector<1x128xf32> to vector<2x128xf32>
      %83 = arith.addf %80, %82 : vector<2x128xf32>
      %cst_54 = arith.constant 0.000000e+00 : f32
      %84 = vector.broadcast %cst_54 : f32 to vector<2x128xf32>
      %85 = arith.maximumf %83, %84 : vector<2x128xf32>
      %c0_55 = arith.constant 0 : index
      %c0_56 = arith.constant 0 : index
      %86 = vector.load %arg11[%c0_55, %c0_56] : memref<128x2xf32, #tpu.memory_space<vmem>>, vector<128x2xf32>
      %cst_57 = arith.constant dense<0.000000e+00> : vector<2x2xf32>
      %87 = tpu.matmul %85, %86, %cst_57 {dimension_numbers = #tpu.dot_dimension_numbers<[1], [0], [0], [1], [0, 0, 1, 1], [], []>} : vector<2x128xf32>, vector<128x2xf32>, vector<2x2xf32> -> vector<2x2xf32>
      %c0_58 = arith.constant 0 : index
      %c0_59 = arith.constant 0 : index
      %88 = vector.load %arg12[%c0_58, %c0_59] : memref<1x2xf32, #tpu.memory_space<vmem>>, vector<1x2xf32>
      %89 = vector.broadcast %88 : vector<1x2xf32> to vector<2x2xf32>
      %90 = arith.addf %87, %89 : vector<2x2xf32>
      %cst_60 = arith.constant dense<0xFF800000> : vector<2xf32>
      %91 = vector.multi_reduction <maximumf>, %90, %cst_60 [1] : vector<2x2xf32> to vector<2xf32>
      %92 = vector.shape_cast %91 : vector<2xf32> to vector<2x1xf32>
      %93 = vector.broadcast %92 : vector<2x1xf32> to vector<2x2xf32>
      %94 = arith.subf %90, %93 : vector<2x2xf32>
      %95 = math.exp %94 : vector<2x2xf32>
      %cst_61 = arith.constant dense<0.000000e+00> : vector<2xf32>
      %96 = vector.multi_reduction <add>, %95, %cst_61 [1] : vector<2x2xf32> to vector<2xf32>
      %97 = vector.shape_cast %96 : vector<2xf32> to vector<2x1xf32>
      %98 = math.log %97 : vector<2x1xf32>
      %99 = arith.addf %92, %98 : vector<2x1xf32>
      %100 = vector.broadcast %99 : vector<2x1xf32> to vector<2x2xf32>
      %101 = arith.subf %90, %100 : vector<2x2xf32>
      %c0_62 = arith.constant 0 : index
      %c0_63 = arith.constant 0 : index
      %102 = vector.load %arg13[%c0_62, %c0_63] : memref<2x2xf32, #tpu.memory_space<vmem>>, vector<2x2xf32>
      tpu.vector_store %arg13[%c0_62, %c0_63], %101 {strides = array<i32>} : memref<2x2xf32, #tpu.memory_space<vmem>>, vector<2x2xf32>,
    } else {
    }
    return
  }
  func.func @transform_0(%arg0: i32, %arg1: i32) -> (i32, i32) {
    %c0_i32 = arith.constant 0 : i32
    %c0_i32_0 = arith.constant 0 : i32
    return %arg1, %c0_i32 : i32, i32
  }
  func.func @transform_1(%arg0: i32, %arg1: i32) -> (i32, i32) {
    %c0_i32 = arith.constant 0 : i32
    %c0_i32_0 = arith.constant 0 : i32
    %c0_i32_1 = arith.constant 0 : i32
    return %c0_i32, %c0_i32_0 : i32, i32
  }
  func.func @transform_2(%arg0: i32, %arg1: i32) -> (i32, i32) {
    %c0_i32 = arith.constant 0 : i32
    %c0_i32_0 = arith.constant 0 : i32
    %c0_i32_1 = arith.constant 0 : i32
    return %c0_i32, %c0_i32_0 : i32, i32
  }
  func.func @transform_3(%arg0: i32, %arg1: i32) -> (i32, i32, i32) {
    %c0_i32 = arith.constant 0 : i32
    %c0_i32_0 = arith.constant 0 : i32
    %c0_i32_1 = arith.constant 0 : i32
    return %arg0, %c0_i32, %c0_i32_0 : i32, i32, i32
  }
  func.func @transform_4(%arg0: i32, %arg1: i32) -> (i32, i32, i32) {
    %c0_i32 = arith.constant 0 : i32
    %c0_i32_0 = arith.constant 0 : i32
    %c0_i32_1 = arith.constant 0 : i32
    return %arg0, %c0_i32, %c0_i32_0 : i32, i32, i32
  }
  func.func @transform_5(%arg0: i32, %arg1: i32) -> (i32, i32, i32) {
    %c0_i32 = arith.constant 0 : i32
    %c0_i32_0 = arith.constant 0 : i32
    %c0_i32_1 = arith.constant 0 : i32
    return %arg0, %c0_i32, %c0_i32_0 : i32, i32, i32
  }
  func.func @transform_6(%arg0: i32, %arg1: i32) -> (i32, i32, i32) {
    %c0_i32 = arith.constant 0 : i32
    %c0_i32_0 = arith.constant 0 : i32
    %c0_i32_1 = arith.constant 0 : i32
    return %arg0, %c0_i32, %c0_i32_0 : i32, i32, i32
  }
  func.func @transform_7(%arg0: i32, %arg1: i32) -> (i32, i32, i32) {
    %c0_i32 = arith.constant 0 : i32
    %c0_i32_0 = arith.constant 0 : i32
    %c0_i32_1 = arith.constant 0 : i32
    %c0_i32_2 = arith.constant 0 : i32
    return %c0_i32, %c0_i32_0, %c0_i32_1 : i32, i32, i32
  }
  func.func @transform_8(%arg0: i32, %arg1: i32) -> (i32, i32) {
    %c0_i32 = arith.constant 0 : i32
    %c0_i32_0 = arith.constant 0 : i32
    %c0_i32_1 = arith.constant 0 : i32
    return %c0_i32, %c0_i32_0 : i32, i32
  }
  func.func @transform_9(%arg0: i32, %arg1: i32) -> (i32, i32) {
    %c0_i32 = arith.constant 0 : i32
    %c0_i32_0 = arith.constant 0 : i32
    %c0_i32_1 = arith.constant 0 : i32
    return %c0_i32, %c0_i32_0 : i32, i32
  }
  func.func @transform_10(%arg0: i32, %arg1: i32) -> (i32, i32) {
    %c0_i32 = arith.constant 0 : i32
    %c0_i32_0 = arith.constant 0 : i32
    %c0_i32_1 = arith.constant 0 : i32
    return %c0_i32, %c0_i32_0 : i32, i32
  }
  func.func @transform_11(%arg0: i32, %arg1: i32) -> (i32, i32) {
    %c0_i32 = arith.constant 0 : i32
    %c0_i32_0 = arith.constant 0 : i32
    %c0_i32_1 = arith.constant 0 : i32
    return %c0_i32, %c0_i32_0 : i32, i32
  }
}

</mosaic_0001>

<bundles_post_ra>
// kernel: tpu_custom_call.1
= control target key start
LH: loop header
LB: loop body
LE: loop exit
PB: predicated region body
PF: predicated region fallthrough
CT: control target
= control target key end

     0   :  { %s3013_s0 = inlined_call_operand.vmem [shape: bf16[128,128], index: 0, kind: input, shape index: {}]   ;;  %s3014_s1 = inlined_call_operand.vmem [shape: bf16[128,128], index: 1, kind: input, shape index: {}]   ;;  %s3015_s2 = inlined_call_operand.vmem [shape: bf16[2,128], index: 2, kind: input, shape index: {}]   ;;  %s3016_s3 = inlined_call_operand.hbm [shape: bf16[3,128,128], index: 3, kind: input, shape index: {}]   ;;  %s3017_s4 = inlined_call_operand.vmem [shape: f32[3,1,128], index: 4, kind: input, shape index: {}]   ;;  %s3018_s5 = inlined_call_operand.hbm [shape: bf16[3,128,128], index: 5, kind: input, shape index: {}]   ;;  %s3019_s6 = inlined_call_operand.vmem [shape: f32[3,1,128], index: 6, kind: input, shape index: {}]   ;;  %s3020_s7 = inlined_call_operand.hbm [shape: f32[3,128,128], index: 7, kind: input, shape index: {}]   ;;  %s3021_s8 = inlined_call_operand.vmem [shape: f32[1,128], index: 8, kind: input, shape index: {}]   ;;  %s3022_s9 = inlined_call_operand.vmem [shape: f32[128,2], index: 9, kind: input, shape index: {}]   ;;  %s3023_s10 = inlined_call_operand.vmem [shape: f32[1,2], index: 10, kind: input, shape index: {}]   ;;  %s3024_s11 = inlined_call_operand.hbm [shape: f32[2,2], index: 11, kind: output, shape index: {}]  }
   0x1   :  { %3033 = sst [smem:[#allocation20_spill]] %s3016_s3 }
   0x2   :  { %3034 = sst [smem:[#allocation21_spill]] %s3018_s5 }
   0x3   :  { %3035 = sst [smem:[#allocation22_spill]] %s3020_s7 }
   0x4   :  { %3036 = sst [smem:[#allocation23_spill]] %s3021_s8 }
   0x5   :  { %3037 = sst [smem:[#allocation24_spill]] %s3023_s10 }
   0x6   :  { %3038 = sst [smem:[#allocation25_spill]] %s3024_s11 }
   0x7   :  { %16 = vsyncpa [#allocation5], 0 }
   0x8   :  { %18 = vsyncpa [#allocation5 + $0x1], 0 }
   0x9   :  { %19 = vsyncpa [#allocation8], 0 }
   0xa   :  { %21 = vsyncpa [#allocation8 + $0x1], 0 }
   0xb   :  { %22 = vsyncpa [#allocation6], 0  ;;  %s2557_s17 = smov 0   ;;  %s2559_s18 = smov 0  }
   0xc   :  { %s2561_s19 = smov 0   ;;  %s2563_s20 = smov 0  }
   0xd   :  { %s2565_s21 = smov 0   ;;  %s2567_s22 = smov 0  }
   0xe   :  { %s2569_s23 = smov 0   ;;  %s2571_s24 = smov 0  }
   0xf LB: > { %3039 = sst [smem:[#allocation15_spill]] %s2462_s19  ;;  %s2596_s25 = sadd.s32 4294967295, %s2482_s24   ;;  %s2482_s24 = sphi %s2571_s24, %s28_s24   ;;  %s2478_s23 = sphi %s2569_s23, %s3068_s23   ;;  %s2474_s22 = sphi %s2567_s22, %s3063_s22   ;;  %s2470_s21 = sphi %s2565_s21, %s3067_s21   ;;  %s2466_s20 = sphi %s2563_s20, %s3062_s20   ;;  %s2462_s19 = sphi %s2561_s19, %s3061_s19   ;;  %s2458_s18 = sphi %s2559_s18, %s3066_s18   ;;  %s2454_s17 = sphi %s2557_s17, %s3065_s17  }
  0x10   : > { %3040 = sst [smem:[#allocation16_spill]] %s2474_s22  ;;  %p128_p0 = scmp.ne.s32.totalorder %s2458_s18, %s2454_s17 }
  0x11   : > { %p3026_p1 = scmp.eq.s32.totalorder %s2596_s25, 0  ;;  %p1629_p2 = scmp.ge.s32.totalorder %s2482_s24, 1 }
  0x12   : > { %p322_p3 = scmp.lt.s32.totalorder %s2482_s24, 7  ;;  %s2484_s28 = smov [#allocation9]  }
  0x13   : > { %p2604_p4 = por %p3026_p1, %p128_p0  ;;  %s340_s29 = sshll.u32 %s2484_s28, 4  ;;  %s341_s29 = int_to_ptr.vmem [resolvable:$true] %s340_s29 }
  0x14   : > { %p2608_p5 = pnand %p1629_p2, %p322_p3  ;;  %s3044_s7 = sld [smem:[#allocation22_spill]] }
  0x15   : > { %s3041_s26 = scalar_select %p2604_p4, 1, 0 }
  0x16   : > { %s3042_s27 = scalar_select %p2608_p5, 1, 0 }
  0x17   : > { %p2167_p6 = pneg %p2608_p5 }
  0x19   : > { %p2616_p7 = pnand %p2167_p6, %p3026_p1 }
  0x1a   : > { %s2290_s14 = scalar_lea.hbm %s3044_s7, 6144 }
  0x1b   : > { %p2291_p8 = scmp.ne.s32.totalorder %s3044_s7, %s2290_s14  ;;  %p2292_p9 = pneg %p2616_p7 }
  0x1c   : > { %p2297_p12 = scmp.lt.u32.totalorder %s2290_s14, %s3044_s7 }
  0x1d   : > { %p2293_p10 = pnand %p2292_p9, %p2291_p8 }
  0x1f   : > { %p2294_p11 = pneg %p2293_p10 }
  0x21   : > { %p2299_p13 = pnand %p2297_p12, %p2294_p11 }
  0x23   : > { %2302 = shalt.err (!%p2299_p13)
}
  0x24   : > { %s2303_s11 = scalar_lea.vmem %s341_s29, 6144  ;;  %p2311_p6 = scmp.lt.s32.totalorder %s341_s29, %s341_s29 }
  0x25   : > { %p2304_p0 = scmp.ne.s32.totalorder %s341_s29, %s2303_s11  ;;  %p2312_p1 = scmp.lt.s32.totalorder %s2303_s11, %s2303_s11 }
  0x27   : > { %p2306_p2 = pnand %p2304_p0, %p2292_p9  ;;  %p2313_p4 = por %p2312_p1, %p2311_p6 }
  0x29   : > { %p2307_p3 = pneg %p2306_p2 }
  0x2b   : > { %p2314_p5 = pnand %p2313_p4, %p2307_p3 }
  0x2d   : > { %2317 = shalt.err (!%p2314_p5)
}
  0x2e   : > { %s2485_s12 = smov 128   ;;  %s2486_s13 = smov 8  }
  0x2f   : > { %2170 = dma.hbm_to_vmem [thread:$0]  (!%p2616_p7), %s3044_s7, 6144, %s341_s29, [#allocation8], %s2485_s12, %s2485_s12, %s2486_s13  }
  0x30   : > { %s37_s11 = sadd.s32 1, %s2474_s22  ;;  %s40_s16 = sadd.s32 1, %s2478_s23 }
  0x31   : > { %p38_p1 = scmp.ge.s32.totalorder %s37_s11, 2  ;;  %s115_s17 = sadd.s32 1, %s2462_s19 }
  0x32   : > { %p122_p4 = scmp.ne.s32.totalorder %s2462_s19, %s2458_s18  ;;  %p123_p5 = scmp.eq.s32.totalorder %s2482_s24, 0 }
  0x33   : > { %s3070_s11 = smov (%p38_p1, %s37_s11), 0  ;;  %s3072_s16 = smov (!%p38_p1, %s40_s16), %s2478_s23 }
  0x34   : > { %3045 = sst [smem:[#allocation17_spill]] %s3070_s11  ;;  %p2179_p8 = scmp.lt.s32.totalorder %s2482_s24, 6 }
  0x35   : > { %p42_p9 = scmp.ge.s32.totalorder %s3072_s16, 3  ;;  %s372_s30 = sand.u32 1, %s2462_s19  }
  0x36   : > { %p124_p10 = por %p123_p5, %p122_p4  ;;  %s2649_s29 = sshll.u32 %s372_s30, 6 }
  0x37   : > { %s3074_s16 = smov (%p42_p9, %s3072_s16), 0  ;;  %s3031_s28 = sshll.u32 %s2478_s23, 10 }
  0x38   : > { %3046 = sst [smem:[#allocation18_spill]] %s3074_s16  ;;  %s112_s12 = ssub.s32 %s2478_s23, %s3074_s16 }
  0x39   : > { %p113_p7 = scmp.eq.s32.totalorder %s112_s12, 0  ;;  %s3047_s3 = sld [smem:[#allocation20_spill]] }
  0x3a   : > { %s376_s7 = scalar_lea.vmem [#allocation4], %s2649_s29  ;;  %p2662_p11 = pnand %p2179_p8, %p124_p10 }
  0x3b   : > { %s383_s11 = sshll.u32 %s376_s7, 4  ;;  %s2671_s12 = scalar_lea.sflag [#allocation5], %s372_s30  ;;  %s2669_s11 = int_to_ptr.vmem [resolvable:$true] %s383_s11 }
  0x3c   : > { %s2667_s16 = scalar_select %p113_p7, %s2462_s19, %s115_s17  }
  0x3d   : > { %p2320_p13 = pneg %p2662_p11 }
  0x3e   : > { %3049 = sst [smem:[#allocation19_spill]] %s2667_s16 }
  0x3f   : > { %s2659_s15 = scalar_lea.hbm %s3047_s3, %s3031_s28  ;;  %s2323_s28 = scalar_lea.hbm %s3047_s3, 3072 }
  0x40   : > { %s2318_s13 = scalar_lea.hbm %s2659_s15, 1024  ;;  %p2324_p3 = scmp.lt.u32.totalorder %s2659_s15, %s3047_s3 }
  0x41   : > { %p2319_p12 = scmp.ne.s32.totalorder %s2659_s15, %s2318_s13  ;;  %p2325_p6 = scmp.lt.u32.totalorder %s2323_s28, %s2318_s13 }
  0x42   : > { %p2327_p4 = scmp.lt.u32.totalorder %s2318_s13, %s2659_s15 }
  0x43   : > { %p2321_p0 = pnand %p2320_p13, %p2319_p12  ;;  %p2326_p1 = por %p2325_p6, %p2324_p3 }
  0x45   : > { %p2322_p2 = pneg %p2321_p0  ;;  %p2328_p5 = por %p2327_p4, %p2326_p1 }
  0x47   : > { %p2329_p8 = pnand %p2328_p5, %p2322_p2 }
  0x49   : > { %2332 = shalt.err (!%p2329_p8)
}
  0x4a   : > { %s2333_s17 = scalar_lea.vmem %s2669_s11, 1024  ;;  %s2487_s30 = smov [#allocation4]  }
  0x4b   : > { %p2334_p9 = scmp.ne.s32.totalorder %s2669_s11, %s2333_s17  ;;  %s2338_s7 = sshll.u32 %s2487_s30, 4  ;;  %s2339_s7 = int_to_ptr.vmem [resolvable:$false] %s2338_s7 }
  0x4c   : > { %s2340_s8 = scalar_lea.vmem %s2339_s7, 2048  ;;  %p2341_p12 = scmp.lt.s32.totalorder %s2669_s11, %s2339_s7 }
  0x4d   : > { %p2336_p10 = pnand %p2334_p9, %p2320_p13  ;;  %p2342_p0 = scmp.lt.s32.totalorder %s2340_s8, %s2333_s17 }
  0x4f   : > { %p2337_p7 = pneg %p2336_p10  ;;  %p2343_p3 = por %p2342_p0, %p2341_p12 }
  0x51   : > { %p2344_p6 = pnand %p2343_p3, %p2337_p7 }
  0x53   : > { %2347 = shalt.err (!%p2344_p6)
}
  0x54   : > { %s2488_s10 = smov 64   ;;  %s2489_s28 = smov 4  }
  0x55   : > { %2174 = dma.hbm_to_vmem [thread:$0]  (!%p2662_p11), %s2659_s15, 1024, %s2669_s11, %s2671_s12, %s2488_s10, %s2488_s10, %s2489_s28  }
  0x56   : > { %s3050_s13 = sshll.u32 %s2478_s23, 10  ;;  %s3051_s5 = sld [smem:[#allocation21_spill]] }
  0x57   : > { %s403_s7 = scalar_lea.vmem [#allocation7], %s2649_s29  ;;  %s399_s3 = sand.u32 1, %s2482_s24  }
  0x58   : > { %s410_s8 = sshll.u32 %s403_s7, 4  ;;  %s2713_s16 = scalar_lea.sflag [#allocation8], %s399_s3  ;;  %s2711_s8 = int_to_ptr.vmem [resolvable:$true] %s410_s8 }
  0x5c   : > { %s2707_s30 = scalar_lea.hbm %s3051_s5, %s3050_s13  ;;  %s2353_s12 = scalar_lea.hbm %s3051_s5, 3072 }
  0x5d   : > { %s2348_s19 = scalar_lea.hbm %s2707_s30, 1024  ;;  %p2354_p5 = scmp.lt.u32.totalorder %s2707_s30, %s3051_s5 }
  0x5e   : > { %p2349_p2 = scmp.ne.s32.totalorder %s2707_s30, %s2348_s19  ;;  %p2355_p8 = scmp.lt.u32.totalorder %s2353_s12, %s2348_s19 }
  0x5f   : > { %p2357_p10 = scmp.lt.u32.totalorder %s2348_s19, %s2707_s30 }
  0x60   : > { %p2351_p1 = pnand %p2349_p2, %p2320_p13  ;;  %p2356_p9 = por %p2355_p8, %p2354_p5 }
  0x62   : > { %p2352_p4 = pneg %p2351_p1  ;;  %p2358_p7 = por %p2357_p10, %p2356_p9 }
  0x64   : > { %p2359_p12 = pnand %p2358_p7, %p2352_p4 }
  0x66   : > { %2362 = shalt.err (!%p2359_p12)
}
  0x67   : > { %s2363_s3 = scalar_lea.vmem %s2711_s8, 1024  ;;  %s2490_s29 = smov [#allocation7]  }
  0x68   : > { %p2364_p0 = scmp.ne.s32.totalorder %s2711_s8, %s2363_s3  ;;  %s2368_s17 = sshll.u32 %s2490_s29, 4  ;;  %s2369_s17 = int_to_ptr.vmem [resolvable:$false] %s2368_s17 }
  0x69   : > { %s2370_s7 = scalar_lea.vmem %s2369_s17, 2048  ;;  %p2371_p2 = scmp.lt.s32.totalorder %s2711_s8, %s2369_s17 }
  0x6a   : > { %p2366_p3 = pnand %p2364_p0, %p2320_p13  ;;  %p2372_p1 = scmp.lt.s32.totalorder %s2370_s7, %s2363_s3 }
  0x6c   : > { %p2367_p6 = pneg %p2366_p3  ;;  %p2373_p5 = por %p2372_p1, %p2371_p2 }
  0x6e   : > { %p2374_p8 = pnand %p2373_p5, %p2367_p6 }
  0x70   : > { %2377 = shalt.err (!%p2374_p8)
}
  0x71   : > { %2177 = dma.hbm_to_vmem [thread:$0]  (!%p2662_p11), %s2707_s30, 1024, %s2711_s8, %s2713_s16, %s2488_s10, %s2488_s10, %s2489_s28  }
  0x72   : > { %p3052_p13 = scmp.ne.s32.totalorder %s3042_s27, 0 }
  0x73   : > { %s430_s19 = sand.u32 (!%p3052_p13), 1, %s2458_s18   ;;  %p3053_p4 = scmp.ne.s32.totalorder (!%p3052_p13), %s3041_s26, 0 }
  0x74   : > { %428 = sbr.rel (%p3052_p13) target bundleno = 1982 (0x7be), region = 64  ;;  %s1639_s11 = sshll.u32 (!%p3052_p13), %s430_s19, 6 }
  0x75   : > { %s431_s15 = scalar_lea.sflag (!%p3052_p13), [#allocation5], %s430_s19  ;;  %s2745_s12 = scalar_lea.vmem (!%p3052_p13), [#allocation4], %s1639_s11 }
  0x7b   : > { %2437 = dma.done.wait (%p3053_p4), %s431_s15, 1024  }
  0x7c   : > { %2439 = vsyncadd (%p3053_p4), %s431_s15, 4294966272  ;;  %s439_s22 = sand.u32 1, %s2596_s25   ;;  %s2752_s16 = scalar_lea.vmem [#allocation7], %s1639_s11 }
  0x7d   : > { %s440_s13 = scalar_lea.sflag [#allocation8], %s439_s22 }
  0x7e   : > { %2441 = dma.done.wait (%p3053_p4), %s440_s13, 1024  }
  0x7f   : > { %2443 = vsyncadd (%p3053_p4), %s440_s13, 4294966272  ;;  %p3054_p11 = scmp.eq.s32.totalorder %s2596_s25, 0 }
  0x81   : > { %2445 = dma.done.wait (%p3054_p11), [#allocation8], 6144   ;;  %p3055_p9 = pmov %p3054_p11 }
  0x82   : > { %s1642_s27 = sshll.u32 %s2466_s20, 3  ;;  %p503_p10 = scmp.lt.s32.totalorder %s2470_s21, 2 }
  0x83   : > { %2447 = vsyncadd (%p3055_p9), [#allocation8], 4294961152  ;;  %p498_p7 = scmp.lt.s32.totalorder %s1642_s27, 15  ;;  %p510_p12 = scmp.lt.s32.totalorder %s2470_s21, 0 }
  0x84   : > { %s2766_s26 = scalar_select %p503_p10, %s2470_s21, 2 }
  0x85   : > { %s3076_s27 = smov (!%p498_p7, %s1642_s27), 15  ;;  %s511_s17 = ssub.s32 0, %s2470_s21 }
  0x86   : > { %s505_s30 = scalar_lea.vmem %s3017_s4, %s2766_s26  ;;  %s508_s3 = scalar_lea.vmem %s3019_s6, %s2766_s26 }
  0x87   : > { %s1643_s29 = sshll.u32 %s3076_s27, 2  ;;  %s1644_s15 = smin.u32 %s2470_s21, %s511_s17 }
  0x88   : > { %s2780_s11 = scalar_lea.vmem %s3013_s0, %s1643_s29  ;;  %s513_s22 = sand.u32 1, %s1644_s15  }
  0x89   : > { %s522_s13 = sadd.s32 1, %s2470_s21  ;;  %s514_s5 = ssub.s32 0, %s513_s22 }
  0x8a   : > { %p523_p0 = scmp.lt.s32.totalorder %s522_s13, 0  ;;  %s3078_s5 = smov (!%p510_p12, %s514_s5), %s513_s22 }
  0x8b   : > { %s524_s10 = ssub.s32 0, %s522_s13  ;;  %p535_p3 = scmp.eq.s32.totalorder %s2470_s21, 0 }
  0x8c   : > { %p1646_p6 = scmp.lt.s32.totalorder %s3078_s5, 0  ;;  %s520_s28 = sadd.s32 2, %s3078_s5 }
  0x8d   : > { %s1647_s8 = smin.u32 %s524_s10, %s522_s13  ;;  %p536_p2 = scmp.eq.s32.totalorder %s2466_s20, 0 }
  0x8e   : > { %s3080_s28 = smov (!%p1646_p6, %s520_s28), %s3078_s5  ;;  %s526_s27 = sand.u32 1, %s1647_s8  }
  0x8f   : > { %p537_p1 = pnand %p536_p2, %p535_p3  ;;  %s527_s14 = ssub.s32 0, %s526_s27 }
  0x90   : > { %s3082_s14 = smov (!%p523_p0, %s527_s14), %s526_s27  ;;  %v2258_v0 = vld [vmem:[%s3014_s1] sm:$0xff] (!%p537_p1)   ;;  %v2259_v1 = vld [vmem:[%s3014_s1 + $0x8] sm:$0xff] (!%p537_p1)   ;;  %v2260_v2 = vld [vmem:[%s3014_s1 + $0x10] sm:$0xff] (!%p537_p1)  }
  0x91   : > { %p1649_p5 = scmp.lt.s32.totalorder %s3082_s14, 0  ;;  %s533_s29 = sadd.s32 2, %s3082_s14  ;;  %605 = vst [vmem:[#allocation2] sm:$0xff] (!%p537_p1), %v2258_v0  ;;  %606 = vst [vmem:[#allocation2 + $0x8] sm:$0xff] (!%p537_p1), %v2259_v1  ;;  %v2261_v3 = vld [vmem:[%s3014_s1 + $0x18] sm:$0xff] (!%p537_p1)   ;;  %v2262_v4 = vld [vmem:[%s3014_s1 + $0x20] sm:$0xff] (!%p537_p1)  }
  0x92   : > { %540 = sbr.rel (%p537_p1) target bundleno = 153 (0x99), region = 80  ;;  %607 = vst [vmem:[#allocation2 + $0x10] sm:$0xff] (!%p537_p1), %v2260_v2  ;;  %608 = vst [vmem:[#allocation2 + $0x18] sm:$0xff] (!%p537_p1), %v2261_v3  ;;  %v2263_v5 = vld [vmem:[%s3014_s1 + $0x28] sm:$0xff] (!%p537_p1)   ;;  %v2264_v6 = vld [vmem:[%s3014_s1 + $0x30] sm:$0xff] (!%p537_p1)  }
  0x93   : > { %s3084_s29 = smov (!%p1649_p5, %s533_s29), %s3082_s14  ;;  %609 = vst [vmem:[#allocation2 + $0x20] sm:$0xff] (!%p537_p1), %v2262_v4  ;;  %610 = vst [vmem:[#allocation2 + $0x28] sm:$0xff] (!%p537_p1), %v2263_v5  ;;  %v2265_v7 = vld [vmem:[%s3014_s1 + $0x38] sm:$0xff] (!%p537_p1)  }
  0x94   : > { %611 = vst [vmem:[#allocation2 + $0x30] sm:$0xff] (!%p537_p1), %v2264_v6  ;;  %612 = vst [vmem:[#allocation2 + $0x38] sm:$0xff] (!%p537_p1), %v2265_v7 }
  0x99 PF: > { %s1658_s5 = sshll.u32 %s3080_s28, 7  ;;  %v2266_v8 = vld [vmem:[%s2780_s11] sm:$0xff]   ;;  %v2270_v12 = vld [vmem:[%s2745_s12] sm:$0xff]   ;;  %v2272_v14 = vld [vmem:[%s2745_s12 + $0x10] sm:$0xff]   ;;  %p1034_p8 = scmp.eq.s32.totalorder %s2466_s20, 1 }
  0x9a   : > { %s614_s13 = sshra.s32 %s1658_s5, 4  ;;  %1827 = vmatprep.mubr.bf16.mxu0 %v2266_v8  ;;  %v2271_v13 = vld [vmem:[%s2745_s12 + $0x8] sm:$0xff]   ;;  %1835 = vmatprep.subr.bf16.mxu1 %v2270_v12  ;;  %v2273_v16 = vld [vmem:[%s2745_s12 + $0x18] sm:$0xff]   ;;  %v2274_v18 = vld [vmem:[%s2745_s12 + $0x20] sm:$0xff]   ;;  %p1685_p13 = scmp.ne.s32.totalorder %s2466_s20, 1 }
  0x9b   : > { %s1659_s10 = sshll.u32 %s614_s13, 3  ;;  %1836 = vmatpush3.bf16.msra.mxu1 %v2270_v12  ;;  %v2275_v20 = vld [vmem:[%s2745_s12 + $0x28] sm:$0xff]   ;;  %v2276_v22 = vld [vmem:[%s2745_s12 + $0x30] sm:$0xff]   ;;  %v2268_v25 = vld [vmem:[%s2780_s11 + $0x10] sm:$0xff]   ;;  %vm2492_vm0 = vmmov (!%p1685_p13), 0   ;;  %p1687_p4 = scmp.ne.s32.totalorder (!%p1685_p13), %s2470_s21, 0 }
  0x9c   : > { %s2813_s8 = scalar_lea.vmem [#allocation2], %s1659_s10  ;;  %1837 = vmatprep.subr.bf16.mxu1 %v2271_v13  ;;  %v2267_v24 = vld [vmem:[%s2780_s11 + $0x8] sm:$0xff]   ;;  %v2269_v26 = vld [vmem:[%s2780_s11 + $0x18] sm:$0xff]   ;;  %v2277_v27 = vld [vmem:[%s2745_s12 + $0x38] sm:$0xff]  }
  0x9d   : > { %v618_v9 = vld [vmem:[%s2813_s8] sm:$0xff]  ;;  %v619_v10 = vld [vmem:[%s2813_s8 + $0x8] sm:$0xff]  ;;  %v620_v11 = vld [vmem:[%s2813_s8 + $0x10] sm:$0xff] }
  0x9e   : > { %1811 = vmatprep.subr.bf16.mxu0 %v618_v9  ;;  %v621_v15 = vld [vmem:[%s2813_s8 + $0x18] sm:$0xff]  ;;  %v622_v17 = vld [vmem:[%s2813_s8 + $0x20] sm:$0xff]  ;;  %v623_v19 = vld [vmem:[%s2813_s8 + $0x28] sm:$0xff] }
  0x9f   : > { %1812 = vmatpush3.bf16.msra.mxu0 %v618_v9  ;;  %1838 = vmatpush3.bf16.msra.mxu1 %v2271_v13  ;;  %v624_v21 = vld [vmem:[%s2813_s8 + $0x30] sm:$0xff]  ;;  %v625_v23 = vld [vmem:[%s2813_s8 + $0x38] sm:$0xff]  ;;  %v2279_v29 = vld [vmem:[%s2752_s16 + $0x8] sm:$0xff]  }
  0xa0   : > { %1813 = vmatprep.subr.bf16.mxu0 %v619_v10  ;;  %1839 = vmatprep.subr.bf16.mxu1 %v2272_v14  ;;  %v2278_v28 = vld [vmem:[%s2752_s16] sm:$0xff]   ;;  %v2280_v30 = vld [vmem:[%s2752_s16 + $0x10] sm:$0xff]   ;;  %v2281_v31 = vld [vmem:[%s2752_s16 + $0x18] sm:$0xff]  }
  0xa1   : > { %v2282_v32 = vld [vmem:[%s2752_s16 + $0x20] sm:$0xff]   ;;  %v2283_v33 = vld [vmem:[%s2752_s16 + $0x28] sm:$0xff]   ;;  %v2284_v46 = vld [vmem:[%s2752_s16 + $0x30] sm:$0xff]  }
  0xa2   : > { %v2285_v47 = vld [vmem:[%s2752_s16 + $0x38] sm:$0xff]   ;;  %v1664_v48 = vld [vmem:[%s505_s30] ss:$0 sm:$0xff]  ;;  %s1682_s16 = sshll.u32 %s3084_s29, 7  ;;  %s1683_s30 = sshll.u32 %s2466_s20, 6 }
  0xa3   : > { %1814 = vmatpush3.bf16.msra.mxu0 %v619_v10  ;;  %1840 = vmatpush3.bf16.msra.mxu1 %v2272_v14  ;;  %s1021_s28 = sadd.s32 %s1683_s30, %s1682_s16  ;;  %v1673_v13 = vld [vmem:[%s508_s3] ss:$0 sm:$0xff]  ;;  %s1038_s26 = sshra.s32 (!%p1685_p13), %s1682_s16, 4 }
  0xa4   : > { %1815 = vmatprep.subr.bf16.mxu0 %v620_v11  ;;  %1841 = vmatprep.subr.bf16.mxu1 %v2273_v16  ;;  %s1026_s17 = sshra.s32 %s1021_s28, 4  ;;  %s1686_s3 = sshll.u32 (!%p1685_p13), %s1038_s26, 3 }
  0xa5   : > { %s1684_s7 = sshll.u32 %s1026_s17, 3  ;;  %s1041_s15 = scalar_lea.vmem (!%p1685_p13), [#allocation2], %s1686_s3 }
  0xa6   : > { %s1029_s19 = scalar_lea.vmem [#allocation2], %s1684_s7 }
  0xa7   : > { %1816 = vmatpush3.bf16.msra.mxu0 %v620_v11  ;;  %1842 = vmatpush3.bf16.msra.mxu1 %v2273_v16 }
  0xa8   : > { %1817 = vmatprep.subr.bf16.mxu0 %v621_v15  ;;  %1843 = vmatprep.subr.bf16.mxu1 %v2274_v18 }
  0xab   : > { %1818 = vmatpush3.bf16.msra.mxu0 %v621_v15  ;;  %1844 = vmatpush3.bf16.msra.mxu1 %v2274_v18 }
  0xac   : > { %1819 = vmatprep.subr.bf16.mxu0 %v622_v17  ;;  %1845 = vmatprep.subr.bf16.mxu1 %v2275_v20 }
  0xaf   : > { %1820 = vmatpush3.bf16.msra.mxu0 %v622_v17  ;;  %1846 = vmatpush3.bf16.msra.mxu1 %v2275_v20 }
  0xb0   : > { %1821 = vmatprep.subr.bf16.mxu0 %v623_v19  ;;  %1847 = vmatprep.subr.bf16.mxu1 %v2276_v22 }
  0xb3   : > { %1822 = vmatpush3.bf16.msra.mxu0 %v623_v19  ;;  %1848 = vmatpush3.bf16.msra.mxu1 %v2276_v22 }
  0xb4   : > { %1823 = vmatprep.subr.bf16.mxu0 %v624_v21  ;;  %1849 = vmatprep.subr.bf16.mxu1 %v2277_v27 }
  0xb7   : > { %1824 = vmatpush3.bf16.msra.mxu0 %v624_v21  ;;  %1850 = vmatpush3.bf16.msra.mxu1 %v2277_v27 }
  0xb8   : > { %1825 = vmatprep.subr.bf16.mxu0 %v625_v23  ;;  %2139 = vmatprep.subr.bf16.mxu1 %v2278_v28 }
  0xbb   : > { %1826 = vmatpush3.bf16.msra.mxu0 %v625_v23 }
  0xbc   : > { %1859 = vmatprep.subr.bf16.mxu0 %v2278_v28 }
  0xbe   : > { %1828 = vmatmul.mubr.bf16.vlgmr.msra.gmra.mrb[0].mxu0 %v2267_v24 }
  0xbf   : > { %1831 = vmatprep.mubr.bf16.mxu0 %v2268_v25  ;;  %1860 = vmatpush3.bf16.msra.mxu0 %v2278_v28 }
  0xc0   : > { %1861 = vmatprep.subr.bf16.mxu0 %v2279_v29 }
  0xc3   : > { %1862 = vmatpush3.bf16.msra.mxu0 %v2279_v29 }
  0xc4   : > { %1863 = vmatprep.subr.bf16.mxu0 %v2280_v30 }
  0xc6   : > { %1832 = vmatmul.mubr.bf16.gmra.mrb[4].mxu0 %v2269_v26 }
  0xc7   : > { %1864 = vmatpush3.bf16.msra.mxu0 %v2280_v30 }
  0xc8   : > { %1865 = vmatprep.subr.bf16.mxu0 %v2281_v31 }
  0xcb   : > { %1866 = vmatpush3.bf16.msra.mxu0 %v2281_v31 }
  0xcc   : > { %1867 = vmatprep.subr.bf16.mxu0 %v2282_v32 }
  0xcf   : > { %1868 = vmatpush3.bf16.msra.mxu0 %v2282_v32 }
  0xd0   : > { %1869 = vmatprep.subr.bf16.mxu0 %v2283_v33 }
  0xd3   : > { %1870 = vmatpush3.bf16.msra.mxu0 %v2283_v33 }
  0xd4   : > { %1871 = vmatprep.subr.bf16.mxu0 %v2284_v46 }
  0xd7   : > { %1872 = vmatpush3.bf16.msra.mxu0 %v2284_v46 }
  0xd8   : > { %1873 = vmatprep.subr.bf16.mxu0 %v2285_v47 }
  0xdb   : > { %1874 = vmatpush3.bf16.msra.mxu0 %v2285_v47 }
 0x191   : > { %v1829_v34 = vpop.f32.mrb[0].mxu0 }
 0x192   : > { %v692_v35 = vpop.f32.mrb[1].mxu0 }
 0x193   : > { %v1830_v36 = vpop.f32.mrb[2].mxu0 }
 0x194   : > { %v724_v37 = vpack.c.bf16 %v1830_v36, %v1829_v34  ;;  %v695_v38 = vpop.f32.mrb[3].mxu0 }
 0x195   : > { %v723_v39 = vpack.c.bf16 %v695_v38, %v692_v35 }
 0x197   : > { %1851 = vmatprep.mubr.bf16.mxu1 %v723_v39 }
 0x198   : > { %1852 = vmatmul.mubr.bf16.vlgmr.msra.gmra.mrb[0].mxu1 %v724_v37 }
 0x199   : > { %v1833_v40 = vpop.f32.mrb[4].mxu0  ;;  %2147 = vmatpush3.bf16.msra.mxu1 %v2278_v28 }
 0x19a   : > { %v708_v41 = vpop.f32.mrb[5].mxu0  ;;  %2140 = vmatprep.subr.bf16.mxu1 %v2279_v29 }
 0x19b   : > { %v1834_v42 = vpop.f32.mrb[6].mxu0 }
 0x19c   : > { %v726_v43 = vpack.c.bf16 %v1834_v42, %v1833_v40  ;;  %v711_v44 = vpop.f32.mrb[7].mxu0  ;;  %v2491_v42 = vmov (!%p1685_p13), 0.0  }
 0x19d   : > { %v725_v45 = vpack.c.bf16 %v711_v44, %v708_v41  ;;  %2148 = vmatpush3.bf16.msra.mxu1 %v2279_v29  ;;  %1883 = vmatprep.subr.bf16.mxu0 (!%p1685_p13), %v2491_v42 }
 0x19e   : > { %2141 = vmatprep.subr.bf16.mxu1 %v2280_v30 }
 0x19f   : > { %1855 = vmatprep.mubr.bf16.mxu1 %v725_v45 }
 0x1a0   : > { %1856 = vmatmul.mubr.bf16.gmra.mrb[4].mxu1 %v726_v43 }
 0x1a1   : > { %2149 = vmatpush3.bf16.msra.mxu1 %v2280_v30 }
 0x1a2   : > { %2142 = vmatprep.subr.bf16.mxu1 %v2281_v31 }
 0x1a5   : > { %2150 = vmatpush3.bf16.msra.mxu1 %v2281_v31 }
 0x1a6   : > { %2143 = vmatprep.subr.bf16.mxu1 %v2282_v32 }
 0x1a9   : > { %2151 = vmatpush3.bf16.msra.mxu1 %v2282_v32 }
 0x1aa   : > { %2144 = vmatprep.subr.bf16.mxu1 %v2283_v33 }
 0x1ad   : > { %2152 = vmatpush3.bf16.msra.mxu1 %v2283_v33 }
 0x1ae   : > { %2145 = vmatprep.subr.bf16.mxu1 %v2284_v46 }
 0x1b1   : > { %2153 = vmatpush3.bf16.msra.mxu1 %v2284_v46 }
 0x1b2   : > { %2146 = vmatprep.subr.bf16.mxu1 %v2285_v47 }
 0x1b5   : > { %2154 = vmatpush3.bf16.msra.mxu1 %v2285_v47 }
 0x26b   : > { %v1853_v49 = vpop.f32.mrb[0].mxu1 }
 0x26c   : > { %v841_v50 = vadd.f32 %v1853_v49, %v1664_v48  ;;  %v832_v51 = vpop.f32.mrb[1].mxu1 }
 0x26d   : > { %v833_v52 = vadd.f32 %v1664_v48, %v832_v51  ;;  %v1854_v53 = vpop.f32.mrb[2].mxu1  ;;  %v1050_v51 = vld [vmem:[%s3015_s2] sm:$0x1] (!%p1685_p13) }
 0x26e   : > { %v844_v54 = vadd.f32 %v1854_v53, %v1664_v48  ;;  %v835_v55 = vpop.f32.mrb[3].mxu1  ;;  %v865_v57 = vmax.f32 %v841_v50, 0.0 }
 0x26f   : > { %v836_v56 = vadd.f32 %v1664_v48, %v835_v55  ;;  %v863_v59 = vmax.f32 %v833_v52, 0.0 }
 0x270   : > { %v866_v58 = vmax.f32 %v844_v54, 0.0 }
 0x271   : > { %v864_v60 = vmax.f32 %v836_v56, 0.0 }
 0x272   : > { %v872_v61 = vpack.c.bf16 %v866_v58, %v865_v57 }
 0x273   : > { %v871_v62 = vpack.c.bf16 %v864_v60, %v863_v59  ;;  %v1857_v63 = vpop.f32.mrb[4].mxu1 }
 0x274   : > { %v857_v0 = vadd.f32 %v1857_v63, %v1664_v48  ;;  %v848_v1 = vpop.f32.mrb[5].mxu1 }
 0x275   : > { %v849_v2 = vadd.f32 %v1664_v48, %v848_v1  ;;  %v1858_v3 = vpop.f32.mrb[6].mxu1  ;;  %1875 = vmatprep.mubr.bf16.mxu0 %v871_v62 }
 0x276   : > { %v860_v4 = vadd.f32 %v1858_v3, %v1664_v48  ;;  %v851_v5 = vpop.f32.mrb[7].mxu1  ;;  %1876 = vmatmul.mubr.bf16.vlgmr.msra.gmra.mrb[8].mxu0 %v872_v61  ;;  %v869_v7 = vmax.f32 %v857_v0, 0.0 }
 0x277   : > { %v852_v6 = vadd.f32 %v1664_v48, %v851_v5  ;;  %v867_v9 = vmax.f32 %v849_v2, 0.0  ;;  %1899 = vmatprep.mubr.msk.bf16.mxu0 (!%p1685_p13), %vm2492_vm0, %v2491_v42 }
 0x278   : > { %v870_v8 = vmax.f32 %v860_v4, 0.0 }
 0x279   : > { %v868_v10 = vmax.f32 %v852_v6, 0.0 }
 0x27a   : > { %v874_v11 = vpack.c.bf16 %v870_v8, %v869_v7 }
 0x27b   : > { %v873_v12 = vpack.c.bf16 %v868_v10, %v867_v9 }
 0x27d   : > { %1879 = vmatprep.mubr.bf16.mxu1 %v873_v12 }
 0x27e   : > { %1880 = vmatmul.mubr.bf16.vlgmr.msra.gmra.mrb[8].mxu1 %v874_v11 }
 0x349   : > { %v1877_v14 = vpop.f32.mrb[8].mxu0 }
 0x34a   : > { %v989_v15 = vadd.f32 %v1877_v14, %v1673_v13  ;;  %v980_v16 = vpop.f32.mrb[9].mxu0 }
 0x34b   : > { %v981_v17 = vadd.f32 %v1673_v13, %v980_v16  ;;  %v1878_v18 = vpop.f32.mrb[10].mxu0 }
 0x34c   : > { %v992_v19 = vadd.f32 %v1878_v18, %v1673_v13  ;;  %v983_v20 = vpop.f32.mrb[11].mxu0  ;;  %v1013_v22 = vmax.f32 %v989_v15, 0.0 }
 0x34d   : > { %v984_v21 = vadd.f32 %v1673_v13, %v983_v20  ;;  %v1011_v24 = vmax.f32 %v981_v17, 0.0 }
 0x34e   : > { %v1014_v23 = vmax.f32 %v992_v19, 0.0 }
 0x34f   : > { %v1012_v25 = vmax.f32 %v984_v21, 0.0 }
 0x350   : > { %v1023_v26 = vpack.c.bf16 %v1014_v23, %v1013_v22 }
 0x351   : > { %v1022_v27 = vpack.c.bf16 %v1012_v25, %v1011_v24  ;;  %v1881_v28 = vpop.f32.mrb[8].mxu1 }
 0x352   : > { %1031 = vst [vmem:[%s1029_s19 + $0x8] sm:$0xff] %v1023_v26  ;;  %v1005_v29 = vadd.f32 %v1881_v28, %v1673_v13  ;;  %v996_v30 = vpop.f32.mrb[9].mxu1 }
 0x353   : > { %1030 = vst [vmem:[%s1029_s19] sm:$0xff] %v1022_v27  ;;  %v997_v31 = vadd.f32 %v1673_v13, %v996_v30  ;;  %v1882_v32 = vpop.f32.mrb[10].mxu1 }
 0x354   : > { %v1008_v33 = vadd.f32 %v1882_v32, %v1673_v13  ;;  %v999_v34 = vpop.f32.mrb[11].mxu1  ;;  %v1017_v36 = vmax.f32 %v1005_v29, 0.0 }
 0x355   : > { %v1000_v35 = vadd.f32 %v1673_v13, %v999_v34  ;;  %v1015_v38 = vmax.f32 %v997_v31, 0.0  ;;  %1037 = sbr.rel (%p1685_p13) target bundleno = 1131 (0x46b), region = 84 }
 0x356   : > { %v1018_v37 = vmax.f32 %v1008_v33, 0.0 }
 0x357   : > { %v1016_v39 = vmax.f32 %v1000_v35, 0.0 }
 0x358   : > { %v1025_v40 = vpack.c.bf16 %v1018_v37, %v1017_v36 }
 0x359   : > { %v1024_v41 = vpack.c.bf16 %v1016_v39, %v1015_v38 }
 0x35a   : > { %1033 = vst [vmem:[%s1029_s19 + $0x18] sm:$0xff] %v1025_v40 }
 0x35b   : > { %1032 = vst [vmem:[%s1029_s19 + $0x10] sm:$0xff] %v1024_v41 }
 0x362   : > { %v1042_v43 = vld [vmem:[%s1041_s15] sm:$0xff]  ;;  %v1043_v44 = vld [vmem:[%s1041_s15 + $0x8] sm:$0xff]  ;;  %v1044_v45 = vld [vmem:[%s1041_s15 + $0x10] sm:$0xff] }
 0x363   : > { %1884 = vmatpush3.bf16.msra.mxu0 %v1042_v43  ;;  %v1045_v46 = vld [vmem:[%s1041_s15 + $0x18] sm:$0xff]  ;;  %v1046_v47 = vld [vmem:[%s1041_s15 + $0x20] sm:$0xff]  ;;  %v1047_v48 = vld [vmem:[%s1041_s15 + $0x28] sm:$0xff] }
 0x364   : > { %1885 = vmatprep.subr.bf16.mxu0 %v2491_v42  ;;  %v1048_v49 = vld [vmem:[%s1041_s15 + $0x30] sm:$0xff]  ;;  %v1049_v50 = vld [vmem:[%s1041_s15 + $0x38] sm:$0xff] }
 0x367   : > { %1886 = vmatpush3.bf16.msra.mxu0 %v1043_v44 }
 0x368   : > { %1887 = vmatprep.subr.bf16.mxu0 %v2491_v42 }
 0x36b   : > { %1888 = vmatpush3.bf16.msra.mxu0 %v1044_v45 }
 0x36c   : > { %1889 = vmatprep.subr.bf16.mxu0 %v2491_v42 }
 0x36f   : > { %1890 = vmatpush3.bf16.msra.mxu0 %v1045_v46 }
 0x370   : > { %1891 = vmatprep.subr.bf16.mxu0 %v2491_v42 }
 0x373   : > { %1892 = vmatpush3.bf16.msra.mxu0 %v1046_v47 }
 0x374   : > { %1893 = vmatprep.subr.bf16.mxu0 %v2491_v42 }
 0x377   : > { %1894 = vmatpush3.bf16.msra.mxu0 %v1047_v48 }
 0x378   : > { %1895 = vmatprep.subr.bf16.mxu0 %v2491_v42 }
 0x37b   : > { %1896 = vmatpush3.bf16.msra.mxu0 %v1048_v49 }
 0x37c   : > { %1897 = vmatprep.subr.bf16.mxu0 %v2491_v42 }
 0x37f   : > { %1898 = vmatpush3.bf16.msra.mxu0 %v1049_v50 }
 0x382   : > { %1900 = vmatmul.mubr.bf16.vlgmr.msra.gmra.mrb[0].mxu0 %v1050_v51 }
 0x452   : > { %1093 = sbr.rel (%p1687_p4) target bundleno = 1113 (0x459), region = 88 }
 0x455   : > { %v1085_v52 = vpop.f32.mrb[0].mxu0 }
 0x456   : > { %v1901_v53 = vpop.f32.mrb[1].mxu0  ;;  %1094 = vst [vmem:[#allocation3] sm:$0x3] (!%p1687_p4), %v1085_v52 }
 0x457   : > { %v1088_v54 = vpop.f32.mrb[2].mxu0 }
 0x458   : > { %v1902_v55 = vpop.f32.mrb[3].mxu0 }
 0x459 PF: > { %p1688_p11 = scmp.ne.s32.totalorder %s2470_s21, 1 }
 0x45a   : > { %1099 = vst [vmem:[#allocation3 + $0x8] sm:$0x3] (!%p1688_p11), %v1085_v52 }
 0x45b   : > { %1098 = sbr.rel (%p1688_p11) target bundleno = 1122 (0x462), region = 92 }
 0x462 PF: > { %p1689_p9 = scmp.ne.s32.totalorder %s2470_s21, 2 }
 0x463   : > { %1104 = vst [vmem:[#allocation3 + $0x10] sm:$0x3] (!%p1689_p9), %v1085_v52 }
 0x464   : > { %1103 = sbr.rel (%p1689_p9) target bundleno = 1131 (0x46b), region = 96 }
 0x46b PF: > { %p1105_p10 = scmp.eq.s32.totalorder %s2470_s21, 2 }
 0x46d   : > { %p1106_p7 = pnand %p1105_p10, %p1034_p8 }
 0x46e   : > { %v1130_v56 = vld [vmem:[#allocation9 + $0x80] sm:$0xff] (!%p1106_p7)  ;;  %v1131_v57 = vld [vmem:[#allocation9 + $0x88] sm:$0xff] (!%p1106_p7)  ;;  %v2493_v59 = vmov (!%p1106_p7), 0.0|0.0   ;;  %v1132_v62 = vld [vmem:[#allocation9 + $0x90] sm:$0xff] (!%p1106_p7)  ;;  %vm2494_vm1 = vmmov (!%p1106_p7), 0   ;;  %v2495_v3 = vmov (!%p1106_p7), 0.0  }
 0x46f   : > { %1109 = sbr.rel (%p1106_p7) target bundleno = 1951 (0x79f), region = 100  ;;  %v1113_v58 = vld [vmem:[#allocation9] sm:$0xff] (!%p1106_p7)  ;;  %2043 = vmatprep.subr.bf16.mxu0 (!%p1106_p7), %v2493_v59  ;;  %v2044_v60 = vpack.c.bf16 (!%p1106_p7), %v1131_v57, %v1130_v56  ;;  %2067 = vmatprep.subr.bf16.mxu1 (!%p1106_p7), %v2493_v59  ;;  %v1114_v61 = vld [vmem:[#allocation9 + $0x8] sm:$0xff] (!%p1106_p7)  ;;  %v1133_v63 = vld [vmem:[#allocation9 + $0x98] sm:$0xff] (!%p1106_p7)  ;;  %s3056_s17 = sld [smem:[#allocation23_spill]] (!%p1106_p7)  ;;  %vm1476_vm2 = vcmask (!%p1106_p7), 9216  }
 0x470   : > { %v2068_v0 = vpack.c.bf16 (!%p1106_p7), %v1114_v61, %v1113_v58  ;;  %v1115_v1 = vld [vmem:[#allocation9 + $0x10] sm:$0xff] (!%p1106_p7)  ;;  %v1116_v2 = vld [vmem:[#allocation9 + $0x18] sm:$0xff] (!%p1106_p7)  ;;  %1935 = vmatprep.mubr.msk.f32.mxu0 (!%p1106_p7), %vm2494_vm1, %v2495_v3  ;;  %1970 = vmatprep.mubr.msk.f32.mxu1 (!%p1106_p7), %vm2494_vm1, %v2495_v3  ;;  %v2047_v4 = vpack.c.bf16 (!%p1106_p7), %v1133_v63, %v1132_v62  ;;  %v1134_v6 = vld [vmem:[#allocation9 + $0xa0] sm:$0xff] (!%p1106_p7)  ;;  %s3057_s26 = sld [smem:[#allocation24_spill]] (!%p1106_p7) }
 0x471   : > { %2045 = vmatpush3.bf16.msra.mxu0 (!%p1106_p7), %v2044_v60  ;;  %v2071_v5 = vpack.c.bf16 (!%p1106_p7), %v1116_v2, %v1115_v1  ;;  %v1135_v7 = vld [vmem:[#allocation9 + $0xa8] sm:$0xff] (!%p1106_p7)  ;;  %v1117_v8 = vld [vmem:[#allocation9 + $0x20] sm:$0xff] (!%p1106_p7)  ;;  %v1136_v12 = vld [vmem:[#allocation9 + $0xb0] sm:$0xff] (!%p1106_p7) }
 0x472   : > { %2069 = vmatpush3.bf16.msra.mxu1 (!%p1106_p7), %v2068_v0  ;;  %2046 = vmatprep.subr.bf16.mxu0 (!%p1106_p7), %v2493_v59  ;;  %v1118_v9 = vld [vmem:[#allocation9 + $0x28] sm:$0xff] (!%p1106_p7)  ;;  %v2050_v10 = vpack.c.bf16 (!%p1106_p7), %v1135_v7, %v1134_v6  ;;  %v1137_v13 = vld [vmem:[#allocation9 + $0xb8] sm:$0xff] (!%p1106_p7)  ;;  %v1119_v14 = vld [vmem:[#allocation9 + $0x30] sm:$0xff] (!%p1106_p7) }
 0x473   : > { %2070 = vmatprep.subr.bf16.mxu1 (!%p1106_p7), %v2493_v59  ;;  %v2074_v11 = vpack.c.bf16 (!%p1106_p7), %v1118_v9, %v1117_v8  ;;  %v1120_v15 = vld [vmem:[#allocation9 + $0x38] sm:$0xff] (!%p1106_p7)  ;;  %v2053_v16 = vpack.c.bf16 (!%p1106_p7), %v1137_v13, %v1136_v12  ;;  %v1138_v18 = vld [vmem:[#allocation9 + $0xc0] sm:$0xff] (!%p1106_p7)  ;;  %v1139_v19 = vld [vmem:[#allocation9 + $0xc8] sm:$0xff] (!%p1106_p7) }
 0x474   : > { %v2077_v17 = vpack.c.bf16 (!%p1106_p7), %v1120_v15, %v1119_v14  ;;  %v1121_v20 = vld [vmem:[#allocation9 + $0x40] sm:$0xff] (!%p1106_p7)  ;;  %v1122_v21 = vld [vmem:[#allocation9 + $0x48] sm:$0xff] (!%p1106_p7)  ;;  %v2056_v22 = vpack.c.bf16 (!%p1106_p7), %v1139_v19, %v1138_v18  ;;  %v1140_v24 = vld [vmem:[#allocation9 + $0xd0] sm:$0xff] (!%p1106_p7) }
 0x475   : > { %2048 = vmatpush3.bf16.msra.mxu0 (!%p1106_p7), %v2047_v4  ;;  %v2080_v23 = vpack.c.bf16 (!%p1106_p7), %v1122_v21, %v1121_v20  ;;  %v1141_v25 = vld [vmem:[#allocation9 + $0xd8] sm:$0xff] (!%p1106_p7)  ;;  %v1123_v26 = vld [vmem:[#allocation9 + $0x50] sm:$0xff] (!%p1106_p7)  ;;  %v1142_v30 = vld [vmem:[#allocation9 + $0xe0] sm:$0xff] (!%p1106_p7) }
 0x476   : > { %2072 = vmatpush3.bf16.msra.mxu1 %v2071_v5  ;;  %2049 = vmatprep.subr.bf16.mxu0 %v2493_v59  ;;  %v1124_v27 = vld [vmem:[#allocation9 + $0x58] sm:$0xff]  ;;  %v2059_v28 = vpack.c.bf16 %v1141_v25, %v1140_v24  ;;  %v1143_v31 = vld [vmem:[#allocation9 + $0xe8] sm:$0xff]  ;;  %v1125_v32 = vld [vmem:[#allocation9 + $0x60] sm:$0xff] }
 0x477   : > { %2073 = vmatprep.subr.bf16.mxu1 %v2493_v59  ;;  %v2083_v29 = vpack.c.bf16 %v1124_v27, %v1123_v26  ;;  %v1126_v33 = vld [vmem:[#allocation9 + $0x68] sm:$0xff]  ;;  %v2062_v34 = vpack.c.bf16 %v1143_v31, %v1142_v30  ;;  %v1144_v36 = vld [vmem:[#allocation9 + $0xf0] sm:$0xff]  ;;  %v1145_v37 = vld [vmem:[#allocation9 + $0xf8] sm:$0xff] }
 0x478   : > { %v2086_v35 = vpack.c.bf16 %v1126_v33, %v1125_v32  ;;  %v1127_v38 = vld [vmem:[#allocation9 + $0x70] sm:$0xff]  ;;  %v1128_v39 = vld [vmem:[#allocation9 + $0x78] sm:$0xff]  ;;  %v2065_v40 = vpack.c.bf16 %v1145_v37, %v1144_v36  ;;  %v1287_v42 = vld [vmem:[#allocation9 + $0x100] sm:$0xff] }
 0x479   : > { %2051 = vmatpush3.bf16.msra.mxu0 %v2050_v10  ;;  %v2089_v41 = vpack.c.bf16 %v1128_v39, %v1127_v38  ;;  %v1288_v43 = vld [vmem:[#allocation9 + $0x108] sm:$0xff]  ;;  %v1111_v44 = vld [vmem:[#allocation3 + $0x8] sm:$0x3]  ;;  %v1290_v48 = vld [vmem:[#allocation9 + $0x118] sm:$0xff] }
 0x47a   : > { %2075 = vmatpush3.bf16.msra.mxu1 %v2074_v11  ;;  %2052 = vmatprep.subr.bf16.mxu0 %v2493_v59  ;;  %v2092_v45 = vpack.c.bf16 %v1288_v43, %v1287_v42  ;;  %v1110_v46 = vld [vmem:[#allocation3] sm:$0x3]  ;;  %v1289_v47 = vld [vmem:[#allocation9 + $0x110] sm:$0xff]  ;;  %v1291_v50 = vld [vmem:[#allocation9 + $0x120] sm:$0xff] }
 0x47b   : > { %2076 = vmatprep.subr.bf16.mxu1 %v2493_v59  ;;  %v2095_v49 = vpack.c.bf16 %v1290_v48, %v1289_v47  ;;  %v1292_v51 = vld [vmem:[#allocation9 + $0x128] sm:$0xff]  ;;  %v1293_v53 = vld [vmem:[#allocation9 + $0x130] sm:$0xff]  ;;  %v1294_v54 = vld [vmem:[#allocation9 + $0x138] sm:$0xff] }
 0x47c   : > { %v2098_v52 = vpack.c.bf16 %v1292_v51, %v1291_v50  ;;  %v2101_v55 = vpack.c.bf16 %v1294_v54, %v1293_v53  ;;  %v1295_v56 = vld [vmem:[#allocation9 + $0x140] sm:$0xff]  ;;  %v1296_v57 = vld [vmem:[#allocation9 + $0x148] sm:$0xff]  ;;  %v1297_v60 = vld [vmem:[#allocation9 + $0x150] sm:$0xff] }
 0x47d   : > { %2054 = vmatpush3.bf16.msra.mxu0 %v2053_v16  ;;  %v2104_v58 = vpack.c.bf16 %v1296_v57, %v1295_v56  ;;  %v1298_v61 = vld [vmem:[#allocation9 + $0x158] sm:$0xff]  ;;  %v1299_v63 = vld [vmem:[#allocation9 + $0x160] sm:$0xff]  ;;  %v1300_v0 = vld [vmem:[#allocation9 + $0x168] sm:$0xff] }
 0x47e   : > { %2078 = vmatpush3.bf16.msra.mxu1 %v2077_v17  ;;  %2055 = vmatprep.subr.bf16.mxu0 %v2493_v59  ;;  %v2107_v62 = vpack.c.bf16 %v1298_v61, %v1297_v60  ;;  %v2110_v1 = vpack.c.bf16 %v1300_v0, %v1299_v63  ;;  %v1301_v2 = vld [vmem:[#allocation9 + $0x170] sm:$0xff]  ;;  %v1112_v5 = vld [vmem:[#allocation3 + $0x10] sm:$0x3]  ;;  %v1383_v6 = vld [vmem:[%s3022_s9] sm:$0xff] }
 0x47f   : > { %2079 = vmatprep.subr.bf16.mxu1 %v2493_v59  ;;  %v1384_v7 = vld [vmem:[%s3022_s9 + $0x8] sm:$0xff]  ;;  %v1385_v8 = vld [vmem:[%s3022_s9 + $0x10] sm:$0xff]  ;;  %v1386_v10 = vld [vmem:[%s3022_s9 + $0x18] sm:$0xff] }
 0x480   : > { %v2116_v9 = vpack.c.bf16 %v1384_v7, %v1383_v6  ;;  %v2119_v11 = vpack.c.bf16 %v1386_v10, %v1385_v8  ;;  %v1387_v12 = vld [vmem:[%s3022_s9 + $0x20] sm:$0xff]  ;;  %v1388_v13 = vld [vmem:[%s3022_s9 + $0x28] sm:$0xff]  ;;  %v1389_v15 = vld [vmem:[%s3022_s9 + $0x30] sm:$0xff] }
 0x481   : > { %2057 = vmatpush3.bf16.msra.mxu0 %v2056_v22  ;;  %v2122_v14 = vpack.c.bf16 %v1388_v13, %v1387_v12  ;;  %v1390_v16 = vld [vmem:[%s3022_s9 + $0x38] sm:$0xff]  ;;  %v1391_v18 = vld [vmem:[%s3022_s9 + $0x40] sm:$0xff]  ;;  %v1392_v19 = vld [vmem:[%s3022_s9 + $0x48] sm:$0xff] }
 0x482   : > { %2081 = vmatpush3.bf16.msra.mxu1 %v2080_v23  ;;  %2058 = vmatprep.subr.bf16.mxu0 %v2493_v59  ;;  %v2125_v17 = vpack.c.bf16 %v1390_v16, %v1389_v15  ;;  %v2128_v20 = vpack.c.bf16 %v1392_v19, %v1391_v18  ;;  %v1393_v21 = vld [vmem:[%s3022_s9 + $0x50] sm:$0xff]  ;;  %v1394_v22 = vld [vmem:[%s3022_s9 + $0x58] sm:$0xff]  ;;  %v1395_v24 = vld [vmem:[%s3022_s9 + $0x60] sm:$0xff] }
 0x483   : > { %2082 = vmatprep.subr.bf16.mxu1 %v2493_v59  ;;  %v2131_v23 = vpack.c.bf16 %v1394_v22, %v1393_v21  ;;  %v1396_v25 = vld [vmem:[%s3022_s9 + $0x68] sm:$0xff]  ;;  %v1397_v27 = vld [vmem:[%s3022_s9 + $0x70] sm:$0xff] }
 0x484   : > { %v2134_v26 = vpack.c.bf16 %v1396_v25, %v1395_v24 }
 0x485   : > { %2060 = vmatpush3.bf16.msra.mxu0 %v2059_v28  ;;  %v1398_v28 = vld [vmem:[%s3022_s9 + $0x78] sm:$0xff] }
 0x486   : > { %2084 = vmatpush3.bf16.msra.mxu1 %v2083_v29  ;;  %2061 = vmatprep.subr.bf16.mxu0 %v2493_v59  ;;  %v2137_v29 = vpack.c.bf16 %v1398_v28, %v1397_v27 }
 0x487   : > { %2085 = vmatprep.subr.bf16.mxu1 %v2493_v59 }
 0x489   : > { %2063 = vmatpush3.bf16.msra.mxu0 %v2062_v34 }
 0x48a   : > { %2087 = vmatpush3.bf16.msra.mxu1 %v2086_v35  ;;  %2064 = vmatprep.subr.bf16.mxu0 %v2493_v59 }
 0x48b   : > { %2088 = vmatprep.subr.bf16.mxu1 %v2493_v59 }
 0x48d   : > { %2066 = vmatpush3.bf16.msra.mxu0 %v2065_v40  ;;  %v1691_v40 = vld [vmem:[%s3057_s26] ss:$0 sm:$0xff] }
 0x48e   : > { %2090 = vmatpush3.bf16.msra.mxu1 %v2089_v41  ;;  %2091 = vmatprep.subr.bf16.mxu0 %v2493_v59 }
 0x48f   : > { %2115 = vmatprep.subr.bf16.mxu1 %v2493_v59 }
 0x490   : > { %1936 = vmatmul.mubr.f32.vlgmr.msra.gmra.mrb[0].mxu0 %v1111_v44 }
 0x491   : > { %1971 = vmatmul.mubr.f32.vlgmr.msra.gmra.mrb[0].mxu1 %v1110_v46  ;;  %2093 = vmatpush3.bf16.msra.mxu0 %v2092_v45 }
 0x492   : > { %2094 = vmatprep.subr.bf16.mxu0 %v2493_v59  ;;  %2005 = vmatprep.mubr.msk.f32.mxu0 %vm2494_vm1, %v2495_v3 }
 0x493   : > { %2040 = vmatprep.mubr.msk.f32.mxu1 %vm2494_vm1, %v2495_v3  ;;  %v1302_v3 = vld [vmem:[#allocation9 + $0x178] sm:$0xff]  ;;  %2117 = vmatpush3.bf16.msra.mxu1 %v2116_v9 }
 0x494   : > { %v2113_v4 = vpack.c.bf16 %v1302_v3, %v1301_v2  ;;  %2118 = vmatprep.subr.bf16.mxu1 %v2493_v59 }
 0x495   : > { %2096 = vmatpush3.bf16.msra.mxu0 %v2095_v49 }
 0x496   : > { %2097 = vmatprep.subr.bf16.mxu0 %v2493_v59 }
 0x497   : > { %2120 = vmatpush3.bf16.msra.mxu1 %v2119_v11 }
 0x498   : > { %2121 = vmatprep.subr.bf16.mxu1 %v2493_v59 }
 0x499   : > { %2099 = vmatpush3.bf16.msra.mxu0 %v2098_v52 }
 0x49a   : > { %2100 = vmatprep.subr.bf16.mxu0 %v2493_v59 }
 0x49b   : > { %2123 = vmatpush3.bf16.msra.mxu1 %v2122_v14 }
 0x49c   : > { %2124 = vmatprep.subr.bf16.mxu1 %v2493_v59 }
 0x49d   : > { %2102 = vmatpush3.bf16.msra.mxu0 %v2101_v55 }
 0x49e   : > { %2103 = vmatprep.subr.bf16.mxu0 %v2493_v59 }
 0x49f   : > { %2126 = vmatpush3.bf16.msra.mxu1 %v2125_v17 }
 0x4a0   : > { %2127 = vmatprep.subr.bf16.mxu1 %v2493_v59 }
 0x4a1   : > { %2105 = vmatpush3.bf16.msra.mxu0 %v2104_v58 }
 0x4a2   : > { %2106 = vmatprep.subr.bf16.mxu0 %v2493_v59 }
 0x4a3   : > { %2129 = vmatpush3.bf16.msra.mxu1 %v2128_v20 }
 0x4a4   : > { %2130 = vmatprep.subr.bf16.mxu1 %v2493_v59 }
 0x4a5   : > { %2108 = vmatpush3.bf16.msra.mxu0 %v2107_v62 }
 0x4a6   : > { %2109 = vmatprep.subr.bf16.mxu0 %v2493_v59 }
 0x4a7   : > { %2132 = vmatpush3.bf16.msra.mxu1 %v2131_v23 }
 0x4a8   : > { %2133 = vmatprep.subr.bf16.mxu1 %v2493_v59 }
 0x4a9   : > { %2111 = vmatpush3.bf16.msra.mxu0 %v2110_v1 }
 0x4aa   : > { %2112 = vmatprep.subr.bf16.mxu0 %v2493_v59 }
 0x4ab   : > { %2135 = vmatpush3.bf16.msra.mxu1 %v2134_v26 }
 0x4ac   : > { %2136 = vmatprep.subr.bf16.mxu1 %v2493_v59  ;;  %v1690_v59 = vld [vmem:[%s3056_s17] ss:$0 sm:$0xff] }
 0x4ad   : > { %2114 = vmatpush3.bf16.msra.mxu0 %v2113_v4 }
 0x4af   : > { %2138 = vmatpush3.bf16.msra.mxu1 %v2137_v29 }
 0x4b0   : > { %2006 = vmatmul.mubr.f32.vlgmr.msra.gmra.mrb[2].mxu0 %v1112_v5 }
 0x563   : > { %v1212_v30 = vpop.f32.mrb[0].mxu0 }
 0x564   : > { %v1937_v31 = vpop.f32.mrb[1].mxu0  ;;  %v1282_v32 = vpop.f32.mrb[0].mxu1 }
 0x565   : > { %v1283_v33 = vadd.f32 %v1282_v32, %v1212_v30  ;;  %v1972_v34 = vpop.f32.mrb[1].mxu1 }
 0x583   : > { %v1369_v35 = vpop.f32.mrb[2].mxu0 }
 0x584   : > { %v1373_v36 = vadd.f32 %v1369_v35, %v1283_v33  ;;  %v2007_v37 = vpop.f32.mrb[3].mxu0 }
 0x586   : > { %v1381_v38 = vadd.f32 %v1690_v59, %v1373_v36 }
 0x588   : > { %v1382_v39 = vmax.f32 %v1381_v38, 0.0 }
 0x58a   : > { %2041 = vmatmul.mubr.f32.vlgmr.msra.gmra.mrb[2].mxu1 %v1382_v39 }
 0x65d   : > { %v1472_v41 = vpop.f32.mrb[2].mxu1 }
 0x65e   : > { %v1473_v42 = vadd.f32 %v1691_v40, %v1472_v41  ;;  %v2042_v43 = vpop.f32.mrb[3].mxu1 }
 0x660   : > { %v1477_v44 = vsel %vm1476_vm2, %v1473_v42, -inf }
 0x661   : > { %1478 = vmax.xlane.f32.xlu0 %v1477_v44 }
 0x6ee   : > { %v1479_v45 = vpop.xlane.xlu0 %1478 }
 0x6ef   : > { %v1480_v46 = vsub.f32 %v1473_v42, %v1479_v45 }
 0x6f1   : > { %v1481_v47 = vmul.f32 1.442695, %v1480_v46 }
 0x6f3   : > { %2286 = vpow2.f32 %v1481_v47 }
 0x6fd   : > { %v2287_v48 = vpop.eup %2286 }
 0x6fe   : > { %v1483_v49 = vsel %vm1476_vm2, %v2287_v48, 0.0 }
 0x6ff   : > { %1484 = vadd.xlane.f32.xlu0 %v1483_v49 }
 0x78c   : > { %v1485_v50 = vpop.xlane.xlu0 %1484 }
 0x78d   : > { %2288 = vlog2.f32 %v1485_v50 }
 0x797   : > { %v2289_v51 = vpop.eup %2288 }
 0x798   : > { %v1487_v52 = vmul.f32 0.6931472, %v2289_v51 }
 0x79a   : > { %v1488_v53 = vadd.f32 %v1487_v52, %v1479_v45 }
 0x79c   : > { %v1489_v54 = vsub.f32 %v1473_v42, %v1488_v53 }
 0x79e   : > { %1490 = vst.msk [vmem:[#allocation10] sm:$0x3] %vm1476_vm2, %v1489_v54 }
 0x79f PF: > { %p2181_p12 = scmp.eq.s32.totalorder %s2596_s25, 5  ;;  %s2496_s3 = smov [#allocation10]  }
 0x7a0   : > { %s1498_s15 = sshll.u32 %s2496_s3, 4  ;;  %s1499_s15 = int_to_ptr.vmem [resolvable:$true] %s1498_s15 }
 0x7a1   : > { %s2378_s29 = scalar_lea.vmem %s1499_s15, 32  ;;  %p2385_p2 = scmp.lt.s32.totalorder %s1499_s15, %s1499_s15 }
 0x7a2   : > { %p2379_p0 = scmp.ne.s32.totalorder %s1499_s15, %s2378_s29  ;;  %p2386_p1 = scmp.lt.s32.totalorder %s2378_s29, %s2378_s29 }
 0x7a4   : > { %p2380_p3 = pnand %p2379_p0, %p2181_p12  ;;  %p2387_p5 = por %p2386_p1, %p2385_p2 }
 0x7a6   : > { %p2381_p6 = pneg %p2380_p3 }
 0x7a8   : > { %p2388_p8 = pnand %p2387_p5, %p2381_p6 }
 0x7aa   : > { %2391 = shalt.err (!%p2388_p8)
}
 0x7ab   : > { %s3058_s21 = sld [smem:[#allocation25_spill]] }
 0x7b1   : > { %s3059_s5 = smov %s3058_s21  ;;  %s2392_s13 = scalar_lea.hbm %s3058_s21, 32 }
 0x7b2   : > { %p2393_p13 = scmp.ne.s32.totalorder %s3059_s5, %s2392_s13  ;;  %p2398_p9 = scmp.lt.u32.totalorder %s2392_s13, %s3059_s5 }
 0x7b4   : > { %p2394_p4 = pnand %p2393_p13, %p2181_p12 }
 0x7b6   : > { %p2395_p11 = pneg %p2394_p4 }
 0x7b8   : > { %p2400_p10 = pnand %p2398_p9, %p2395_p11 }
 0x7ba   : > { %2403 = shalt.err (!%p2400_p10)
}
 0x7bb   : > { %2164 = dma.vmem_to_hbm [thread:$0]  (%p2181_p12), %s1499_s15, 32, %s3059_s5, [#allocation6]  }
 0x7bc   : > { %2449 = dma.done.wait (%p2181_p12), [#allocation6], 32  }
 0x7bd   : > { %2451 = vsyncadd (%p2181_p12), [#allocation6], 4294967264 }
 0x7be PF: > { %s28_s24 = sadd.s32 1, %s2482_s24   ;;  %s3060_s28 = sld [smem:[#allocation15_spill]] }
 0x7bf   : > { %p25_p7 = scmp.ge.s32.totalorder %s28_s24, 8   ;;  %s3061_s19 = sld [smem:[#allocation19_spill]] }
 0x7c0   : > { %s3062_s20 = sld [smem:[#allocation16_spill]]  ;;  %s3063_s22 = sld [smem:[#allocation17_spill]] }
 0x7c1   : > { %s3064_s27 = sld [smem:[#allocation18_spill]]  ;;  %s3065_s17 = smov %s2458_s18 }
 0x7c2   : > { %s3067_s21 = smov %s2478_s23  ;;  %27 = sbr.rel (!%p25_p7) target bundleno = 15 (0xf), region = 156 }
 0x7c4   : > { %s3066_s18 = smov %s3060_s28 }
 0x7c7   : > { %s3068_s23 = smov %s3064_s27 }
 0x7c9   :  { %1511 = vsyncpa [#allocation5], 1 }
 0x7ca   :  { %1513 = vsyncpa [#allocation5 + $0x1], 1 }
 0x7cb   :  { %1514 = vsyncpa [#allocation8], 1 }
 0x7cc   :  { %1516 = vsyncpa [#allocation8 + $0x1], 1 }
 0x7cd   :  { %1517 = vsyncpa [#allocation6], 1 }
 0x7ce   :  { %1519 = vsyncpa [#allocation6 + $0x1], 1 }

</bundles_post_ra>
